<compile_context>
chip_gen: v7x
topology: tpu7x:2x2x1
jax: 0.10.0
libtpu: 0.0.40
codegen_flags: <defaults>
</compile_context>

<pallas_src>
import functools
import math

import jax
import jax.numpy as jnp
from jax.experimental import pallas as pl
from jax.experimental.pallas import tpu as pltpu


# ---------------------------------------------------------------------------
# helpers
# ---------------------------------------------------------------------------
def _round_up(x, m):
    return (x + m - 1) // m * m


def _gelu(x, approx):
    if approx:
        # tanh-form GELU: routes the transcendental to the EUP slot.
        return jax.nn.gelu(x, approximate=True)
    # PyTorch nn.GELU() default (erf form) - exact-accuracy mode.
    return 0.5 * x * (1.0 + jax.lax.erf(x * (1.0 / math.sqrt(2.0))))


# ---------------------------------------------------------------------------
# Pallas kernel: entire forward pass for one batch tile
# ---------------------------------------------------------------------------
def _fusion_kernel(
    x_ref,          # (TB, IN_PAD)       concat([content|cat|num]), zero padded
    w_in_ref,       # (IN_PAD, HID_PAD)  block-diag [Wc | Wcat | Wnum]
    w_fold_ref,     # (HID_PAD, OUT_PAD) folded (attn @ [Wf | wg]); gate col = out_dim
    rows_hid_ref,   # (8, HID_PAD) rows: b_in, gamma_in, beta_in, mask_c, mask_cat, mask_num, 0, 0
    rows_out_ref,   # (8, OUT_PAD) rows: b_fold(+bg at gate lane), gamma_f, beta_f, out_mask, 0...
    out_ref,        # (TB, OUT_PAD)
    *,
    group_sizes, out_dim, gelu_approx, eps=1e-5,
):
    f32 = jnp.float32
    x = x_ref[...]
    w_in = w_in_ref[...]
    w_fold = w_fold_ref[...]

    b_in = rows_hid_ref[0:1, :]
    g_in = rows_hid_ref[1:2, :]
    beta_in = rows_hid_ref[2:3, :]

    b_z = rows_out_ref[0:1, :]
    g_f = rows_out_ref[1:2, :]
    beta_f = rows_out_ref[2:3, :]
    out_mask = rows_out_ref[3:4, :]

    # ---- block-diagonal input projection: [content|cat|num] -> hidden groups
    h = jnp.dot(x, w_in, preferred_element_type=f32) + b_in

    # ---- per-group LayerNorm, two-pass masked statistics.
    # Masks come from resident VMEM rows (no per-tile iota/compare rebuilds).
    # TODO(synk): if a bundle profile shows the XLU reductions saturating, swap
    # these for two matmuls against a constant group-mean selector matrix (MXU
    # is nearly idle after the w_att fold).
    mu_lane = jnp.zeros_like(h)
    groups = []
    for g, size in enumerate(group_sizes):
        if size == 0:
            continue
        m = rows_hid_ref[3 + g:4 + g, :]
        inv_d = 1.0 / float(size)
        mu_g = jnp.sum(h * m, axis=-1, keepdims=True) * inv_d
        mu_lane = mu_lane + m * mu_g
        groups.append((m, inv_d))
    d = h - mu_lane                      # pad lanes stay exactly 0
    d2 = d * d
    scale_lane = jnp.zeros_like(h)
    for m, inv_d in groups:
        var_g = jnp.sum(d2 * m, axis=-1, keepdims=True) * inv_d
        scale_lane = scale_lane + m * jax.lax.rsqrt(var_g + eps)
    # gamma/beta are zero on padded lanes -> pad lanes stay exactly 0 (GELU(0)=0)
    h_proc = _gelu(d * (scale_lane * g_in) + beta_in, gelu_approx)

    # ---- single folded matmul: (attn -> fusion linear) and the gate column
    z = jnp.dot(h_proc.astype(w_fold.dtype), w_fold,
                preferred_element_type=f32) + b_z

    # gate logit lives in spare lane `out_dim` (excluded from LN by out_mask)
    gate = jax.nn.sigmoid(z[:, out_dim:out_dim + 1])

    # ---- fused LayerNorm (two-pass, masked over the real out_dim lanes) + GELU
    inv_o = 1.0 / float(out_dim)
    mu = jnp.sum(z * out_mask, axis=-1, keepdims=True) * inv_o
    dz = z - mu
    dzm = dz * out_mask
    var = jnp.sum(dzm * dzm, axis=-1, keepdims=True) * inv_o
    fused = _gelu(dz * (jax.lax.rsqrt(var + eps) * g_f) + beta_f, gelu_approx)

    out_ref[...] = (fused * (1.0 + gate)).astype(out_ref.dtype)


# ---------------------------------------------------------------------------
# Wrapper: fold/pack/pad parameters, build grid, call pallas_call
# ---------------------------------------------------------------------------
def content_aware_feature_fusion(content, categorical, numerical, params, *,
                                 block_b=1024, use_bf16=True, gelu_approx=True,
                                 out_dtype=jnp.float32):
    f32 = jnp.float32
    B, content_dim = content.shape
    cat_dim = categorical.shape[1]
    num_dim = numerical.shape[1]
    half = params["wc"].shape[1]
    q1 = params["wcat"].shape[1]
    q2 = params["wnum"].shape[1]
    hid = half + q1 + q2
    out_dim = params["wf"].shape[1]
    in_dim = content_dim + cat_dim + num_dim

    IN_PAD = _round_up(in_dim, 128)
    HID_PAD = _round_up(hid, 128)
    OUT_PAD = _round_up(out_dim + 1, 128)   # +1 guarantees a spare gate lane

    # batch tile: multiple of 8; ensure >=2 grid steps when B allows so
    # dimension_semantics=("parallel",) can use both v7x TensorCores.
    B8 = _round_up(B, 8)
    tb_cap = max(8, (B8 // 2) // 8 * 8) if B8 >= 16 else B8
    TB = max(8, min((block_b // 8) * 8, tb_cap))
    B_pad = _round_up(B, TB)

    in_dtype = jnp.bfloat16 if use_bf16 else f32

    # ---- lane-dense input; cast before pad so the HBM round trip is half-width
    x = jnp.concatenate([content.astype(in_dtype),
                         categorical.astype(in_dtype),
                         numerical.astype(in_dtype)], axis=1)
    x = jnp.pad(x, ((0, B_pad - B), (0, IN_PAD - in_dim)))

    # ---- block-diagonal input weight (content|cat|num -> hidden groups)
    w_in = jnp.zeros((IN_PAD, HID_PAD), f32)
    w_in = w_in.at[0:content_dim, 0:half].set(params["wc"])
    w_in = w_in.at[content_dim:content_dim + cat_dim, half:half + q1].set(params["wcat"])
    w_in = w_in.at[content_dim + cat_dim:in_dim, half + q1:hid].set(params["wnum"])

    # ---- fold seq-len-1 attention (exact) into the fusion linear AND the gate
    #      vector; all products in f32 before any bf16 cast.
    w_att = params["wv"] @ params["wo"]                     # (half, half)
    b_att = params["bv"] @ params["wo"] + params["bo"]      # (half,)
    w_att_full = jnp.zeros((hid, hid), f32)
    w_att_full = w_att_full.at[:half, :half].set(w_att)
    w_att_full = w_att_full.at[half:, half:].set(jnp.eye(q1 + q2, dtype=f32))
    b_att_full = jnp.concatenate([b_att, jnp.zeros((q1 + q2,), f32)])

    w_z = w_att_full @ params["wf"]                          # (hid, out_dim)
    b_z = b_att_full @ params["wf"] + params["bf"]           # (out_dim,)
    wg_f = w_att_full @ params["wg"]                         # (hid,)
    bg_f = b_att_full @ params["wg"] + params["bg"]          # scalar

    w_fold = jnp.zeros((HID_PAD, OUT_PAD), f32)
    w_fold = w_fold.at[:hid, :out_dim].set(w_z)
    w_fold = w_fold.at[:hid, out_dim].set(wg_f)              # gate column

    # ---- pack small row parameters + group masks into two (8, 128k) blocks
    def _row(parts, width):
        v = jnp.concatenate([jnp.asarray(p, f32).reshape(-1) for p in parts])
        return jnp.pad(v, (0, width - v.shape[0]))

    def _mask(lo, hi, width):
        idx = jnp.arange(width)
        return ((idx >= lo) & (idx < hi)).astype(f32)

    zero_hid = jnp.zeros((HID_PAD,), f32)
    rows_hid = jnp.stack([
        _row([params["bc"], params["bcat"], params["bnum"]], HID_PAD),
        _row([params["gc"], params["gcat"], params["gnum"]], HID_PAD),
        _row([params["betac"], params["betacat"], params["betanum"]], HID_PAD),
        _mask(0, half, HID_PAD),
        _mask(half, half + q1, HID_PAD),
        _mask(half + q1, hid, HID_PAD),
        zero_hid, zero_hid,
    ])
    zero_out = jnp.zeros((OUT_PAD,), f32)
    b_row = zero_out.at[:out_dim].set(b_z).at[out_dim].set(bg_f)
    rows_out = jnp.stack([
        b_row,
        _row([params["gf"]], OUT_PAD),
        _row([params["betaf"]], OUT_PAD),
        _mask(0, out_dim, OUT_PAD),          # real-lane mask (excludes gate lane)
        zero_out, zero_out, zero_out, zero_out,
    ])

    if use_bf16:  # bf16 MXU operands, f32 accumulation / elementwise
        w_in = w_in.astype(jnp.bfloat16)
        w_fold = w_fold.astype(jnp.bfloat16)

    kernel = functools.partial(
        _fusion_kernel, group_sizes=(half, q1, q2), out_dim=out_dim,
        gelu_approx=gelu_approx)

    out_pad = pl.pallas_call(
        kernel,
        out_shape=jax.ShapeDtypeStruct((B_pad, OUT_PAD), out_dtype),
        grid=(B_pad // TB,),
        in_specs=[
            pl.BlockSpec((TB, IN_PAD), lambda i: (i, 0)),        # batch-tiled input
            pl.BlockSpec((IN_PAD, HID_PAD), lambda i: (0, 0)),   # resident weights
            pl.BlockSpec((HID_PAD, OUT_PAD), lambda i: (0, 0)),
            pl.BlockSpec((8, HID_PAD), lambda i: (0, 0)),        # packed row params
            pl.BlockSpec((8, OUT_PAD), lambda i: (0, 0)),
        ],
        out_specs=pl.BlockSpec((TB, OUT_PAD), lambda i: (i, 0)),
        compiler_params=pltpu.CompilerParams(
            dimension_semantics=("parallel",),
            vmem_limit_bytes=32 * 1024 * 1024,
        ),
    )(x, w_in, w_fold, rows_hid, rows_out)

    return out_pad[:B, :out_dim]


# ---------------------------------------------------------------------------
# Parameters (pre-transposed to (in, out)) and a pure-JAX reference
# ---------------------------------------------------------------------------
class _KeyGen:
    def __init__(self, key):
        self._key = key

    def __call__(self):
        self._key, sub = jax.random.split(self._key)
        return sub


def make_params(key, content_dim, categorical_dims, numerical_dim, output_dim):
    f32 = jnp.float32
    half, quarter = output_dim // 2, output_dim // 4
    total_cat = sum(categorical_dims)
    kg = _KeyGen(key)

    def w(shape):
        return jax.random.normal(kg(), shape, f32) * 0.02

    def gb(dim):  # LayerNorm gamma (near 1) / beta (small)
        return (1.0 + 0.1 * jax.random.normal(kg(), (dim,), f32),
                0.1 * jax.random.normal(kg(), (dim,), f32))

    p = {}
    p["wc"], p["bc"] = w((content_dim, half)), w((half,))
    p["gc"], p["betac"] = gb(half)
    p["wv"], p["bv"] = w((half, half)), w((half,))
    p["wo"], p["bo"] = w((half, half)), w((half,))
    p["wcat"], p["bcat"] = w((total_cat, quarter)), w((quarter,))
    p["gcat"], p["betacat"] = gb(quarter)
    p["wnum"], p["bnum"] = w((numerical_dim, quarter)), w((quarter,))
    p["gnum"], p["betanum"] = gb(quarter)
    fusion_in = half + 2 * quarter
    p["wf"], p["bf"] = w((fusion_in, output_dim)), w((output_dim,))
    p["gf"], p["betaf"] = gb(output_dim)
    p["wg"], p["bg"] = w((fusion_in,)), w(())
    return p


def _reference(content, categorical, numerical, p):
    def ln(x, g, b, eps=1e-5):
        mu = jnp.mean(x, -1, keepdims=True)
        var = jnp.mean((x - mu) ** 2, -1, keepdims=True)
        return (x - mu) / jnp.sqrt(var + eps) * g + b

    def gelu(x):
        return 0.5 * x * (1.0 + jax.lax.erf(x * (1.0 / math.sqrt(2.0))))

    h_c = gelu(ln(content @ p["wc"] + p["bc"], p["gc"], p["betac"]))
    attended = (h_c @ p["wv"] + p["bv"]) @ p["wo"] + p["bo"]   # seq-len-1 MHA
    h_cat = gelu(ln(categorical @ p["wcat"] + p["bcat"], p["gcat"], p["betacat"]))
    h_num = gelu(ln(numerical @ p["wnum"] + p["bnum"], p["gnum"], p["betanum"]))
    comb = jnp.concatenate([attended, h_cat, h_num], -1)
    gate = jax.nn.sigmoid(comb @ p["wg"][:, None] + p["bg"])
    fused = gelu(ln(comb @ p["wf"] + p["bf"], p["gf"], p["betaf"]))
    return fused * (1.0 + gate)


if __name__ == "__main__":
    B = 256
    content_dim = 32
    categorical_dims = [3, 5]   # total_cat_dim = 8
    numerical_dim = 8
    output_dim = 32             # embed_dim = 16, 8 heads -> head_dim 2

    key = jax.random.PRNGKey(0)
    k_in, k_p = jax.random.split(key)
    kc, kcat, knum = jax.random.split(k_in, 3)

    content = jax.random.normal(kc, (B, content_dim), jnp.float32)
    categorical = jax.random.normal(kcat, (B, sum(categorical_dims)), jnp.float32)
    numerical = jax.random.normal(knum, (B, numerical_dim), jnp.float32)

    params = make_params(k_p, content_dim, categorical_dims, numerical_dim, output_dim)
    ref = _reference(content, categorical, numerical, params)

    # 1) strict-accuracy mode: f32 MXU operands + exact erf GELU, tight tolerance
    out_exact = content_aware_feature_fusion(
        content, categorical, numerical, params,
        use_bf16=False, gelu_approx=False)
    out_exact = jax.block_until_ready(out_exact)
    assert out_exact.shape == (B, output_dim)
    assert bool(jnp.all(jnp.isfinite(out_exact)))
    err = float(jnp.max(jnp.abs(out_exact - ref)))
    assert err < 1e-3, f"exact-mode max abs err vs reference: {err}"

    # 2) performance defaults: bf16 MXU operands + tanh-approx GELU
    #    (loose smoke tolerance; bf16 rounding is amplified by the fused LayerNorm)
    out_fast = content_aware_feature_fusion(content, categorical, numerical, params)
    out_fast = jax.block_until_ready(out_fast)
    assert out_fast.shape == (B, output_dim)
    assert bool(jnp.all(jnp.isfinite(out_fast)))
    err_fast = float(jnp.max(jnp.abs(out_fast - ref)))
    assert err_fast < 1e-1, f"fast-mode max abs err vs reference: {err_fast}"

    print("KERNEL_OK")
</pallas_src>

<mosaic_0001>
module attributes {stable_mosaic.version = 11 : i64} {
  func.func @_fusion_kernel(%arg0: i32, %arg1: memref<128x128xf32, #tpu.memory_space<vmem>>, %arg2: memref<128x128xf32, #tpu.memory_space<vmem>>, %arg3: memref<128x128xf32, #tpu.memory_space<vmem>>, %arg4: memref<8x128xf32, #tpu.memory_space<vmem>>, %arg5: memref<8x128xf32, #tpu.memory_space<vmem>>, %arg6: memref<128x128xf32, #tpu.memory_space<vmem>>) attributes {dimension_semantics = [#tpu.dimension_semantics<parallel>], iteration_bounds = array<i64: 2>, scalar_prefetch = 0 : i64, scratch_operands = 0 : i64, tpu.core_type = #tpu.core_type<tc>, window_params = [{transform_indices = @transform_0, window_bounds = array<i64: 128, 128>}, {pipeline_mode = #tpu.pipeline_mode<synchronous>, transform_indices = @transform_1, window_bounds = array<i64: 128, 128>}, {pipeline_mode = #tpu.pipeline_mode<synchronous>, transform_indices = @transform_2, window_bounds = array<i64: 128, 128>}, {pipeline_mode = #tpu.pipeline_mode<synchronous>, transform_indices = @transform_3, window_bounds = array<i64: 8, 128>}, {pipeline_mode = #tpu.pipeline_mode<synchronous>, transform_indices = @transform_4, window_bounds = array<i64: 8, 128>}, {transform_indices = @transform_5, window_bounds = array<i64: 128, 128>}]} {
    %c0 = arith.constant 0 : index
    %c0_0 = arith.constant 0 : index
    %0 = vector.load %arg1[%c0, %c0_0] : memref<128x128xf32, #tpu.memory_space<vmem>>, vector<128x128xf32>
    %c0_1 = arith.constant 0 : index
    %c0_2 = arith.constant 0 : index
    %1 = vector.load %arg2[%c0_1, %c0_2] : memref<128x128xf32, #tpu.memory_space<vmem>>, vector<128x128xf32>
    %c0_3 = arith.constant 0 : index
    %c0_4 = arith.constant 0 : index
    %2 = vector.load %arg3[%c0_3, %c0_4] : memref<128x128xf32, #tpu.memory_space<vmem>>, vector<128x128xf32>
    %c0_5 = arith.constant 0 : index
    %c0_6 = arith.constant 0 : index
    %3 = vector.load %arg4[%c0_5, %c0_6] : memref<8x128xf32, #tpu.memory_space<vmem>>, vector<1x128xf32>
    %c1 = arith.constant 1 : index
    %c0_7 = arith.constant 0 : index
    %4 = vector.load %arg4[%c1, %c0_7] : memref<8x128xf32, #tpu.memory_space<vmem>>, vector<1x128xf32>
    %c2 = arith.constant 2 : index
    %c0_8 = arith.constant 0 : index
    %5 = vector.load %arg4[%c2, %c0_8] : memref<8x128xf32, #tpu.memory_space<vmem>>, vector<1x128xf32>
    %c0_9 = arith.constant 0 : index
    %c0_10 = arith.constant 0 : index
    %6 = vector.load %arg5[%c0_9, %c0_10] : memref<8x128xf32, #tpu.memory_space<vmem>>, vector<1x128xf32>
    %c1_11 = arith.constant 1 : index
    %c0_12 = arith.constant 0 : index
    %7 = vector.load %arg5[%c1_11, %c0_12] : memref<8x128xf32, #tpu.memory_space<vmem>>, vector<1x128xf32>
    %c2_13 = arith.constant 2 : index
    %c0_14 = arith.constant 0 : index
    %8 = vector.load %arg5[%c2_13, %c0_14] : memref<8x128xf32, #tpu.memory_space<vmem>>, vector<1x128xf32>
    %c3 = arith.constant 3 : index
    %c0_15 = arith.constant 0 : index
    %9 = vector.load %arg5[%c3, %c0_15] : memref<8x128xf32, #tpu.memory_space<vmem>>, vector<1x128xf32>
    %cst = arith.constant dense<0.000000e+00> : vector<128x128xf32>
    %10 = tpu.matmul %0, %1, %cst {dimension_numbers = #tpu.dot_dimension_numbers<[1], [0], [0], [1], [0, 0, 1, 1], [], []>} : vector<128x128xf32>, vector<128x128xf32>, vector<128x128xf32> -> vector<128x128xf32>
    %11 = vector.broadcast %3 : vector<1x128xf32> to vector<128x128xf32>
    %12 = arith.addf %10, %11 : vector<128x128xf32>
    %cst_16 = arith.constant 0.000000e+00 : f32
    %13 = vector.broadcast %cst_16 : f32 to vector<128x128xf32>
    %c3_17 = arith.constant 3 : index
    %c0_18 = arith.constant 0 : index
    %14 = vector.load %arg4[%c3_17, %c0_18] : memref<8x128xf32, #tpu.memory_space<vmem>>, vector<1x128xf32>
    %15 = vector.broadcast %14 : vector<1x128xf32> to vector<128x128xf32>
    %16 = arith.mulf %12, %15 : vector<128x128xf32>
    %cst_19 = arith.constant dense<0.000000e+00> : vector<128xf32>
    %17 = vector.multi_reduction <add>, %16, %cst_19 [1] : vector<128x128xf32> to vector<128xf32>
    %18 = vector.shape_cast %17 : vector<128xf32> to vector<128x1xf32>
    %cst_20 = arith.constant 6.250000e-02 : f32
    %19 = vector.broadcast %cst_20 : f32 to vector<128x1xf32>
    %20 = arith.mulf %18, %19 : vector<128x1xf32>
    %21 = vector.broadcast %14 : vector<1x128xf32> to vector<128x128xf32>
    %22 = vector.broadcast %20 : vector<128x1xf32> to vector<128x128xf32>
    %23 = arith.mulf %21, %22 : vector<128x128xf32>
    %24 = arith.addf %13, %23 : vector<128x128xf32>
    %c4 = arith.constant 4 : index
    %c0_21 = arith.constant 0 : index
    %25 = vector.load %arg4[%c4, %c0_21] : memref<8x128xf32, #tpu.memory_space<vmem>>, vector<1x128xf32>
    %26 = vector.broadcast %25 : vector<1x128xf32> to vector<128x128xf32>
    %27 = arith.mulf %12, %26 : vector<128x128xf32>
    %cst_22 = arith.constant dense<0.000000e+00> : vector<128xf32>
    %28 = vector.multi_reduction <add>, %27, %cst_22 [1] : vector<128x128xf32> to vector<128xf32>
    %29 = vector.shape_cast %28 : vector<128xf32> to vector<128x1xf32>
    %cst_23 = arith.constant 1.250000e-01 : f32
    %30 = vector.broadcast %cst_23 : f32 to vector<128x1xf32>
    %31 = arith.mulf %29, %30 : vector<128x1xf32>
    %32 = vector.broadcast %25 : vector<1x128xf32> to vector<128x128xf32>
    %33 = vector.broadcast %31 : vector<128x1xf32> to vector<128x128xf32>
    %34 = arith.mulf %32, %33 : vector<128x128xf32>
    %35 = arith.addf %24, %34 : vector<128x128xf32>
    %c5 = arith.constant 5 : index
    %c0_24 = arith.constant 0 : index
    %36 = vector.load %arg4[%c5, %c0_24] : memref<8x128xf32, #tpu.memory_space<vmem>>, vector<1x128xf32>
    %37 = vector.broadcast %36 : vector<1x128xf32> to vector<128x128xf32>
    %38 = arith.mulf %12, %37 : vector<128x128xf32>
    %cst_25 = arith.constant dense<0.000000e+00> : vector<128xf32>
    %39 = vector.multi_reduction <add>, %38, %cst_25 [1] : vector<128x128xf32> to vector<128xf32>
    %40 = vector.shape_cast %39 : vector<128xf32> to vector<128x1xf32>
    %cst_26 = arith.constant 1.250000e-01 : f32
    %41 = vector.broadcast %cst_26 : f32 to vector<128x1xf32>
    %42 = arith.mulf %40, %41 : vector<128x1xf32>
    %43 = vector.broadcast %36 : vector<1x128xf32> to vector<128x128xf32>
    %44 = vector.broadcast %42 : vector<128x1xf32> to vector<128x128xf32>
    %45 = arith.mulf %43, %44 : vector<128x128xf32>
    %46 = arith.addf %35, %45 : vector<128x128xf32>
    %47 = arith.subf %12, %46 : vector<128x128xf32>
    %48 = arith.mulf %47, %47 : vector<128x128xf32>
    %cst_27 = arith.constant 0.000000e+00 : f32
    %49 = vector.broadcast %cst_27 : f32 to vector<128x128xf32>
    %50 = vector.broadcast %14 : vector<1x128xf32> to vector<128x128xf32>
    %51 = arith.mulf %48, %50 : vector<128x128xf32>
    %cst_28 = arith.constant dense<0.000000e+00> : vector<128xf32>
    %52 = vector.multi_reduction <add>, %51, %cst_28 [1] : vector<128x128xf32> to vector<128xf32>
    %53 = vector.shape_cast %52 : vector<128xf32> to vector<128x1xf32>
    %cst_29 = arith.constant 6.250000e-02 : f32
    %54 = vector.broadcast %cst_29 : f32 to vector<128x1xf32>
    %55 = arith.mulf %53, %54 : vector<128x1xf32>
    %cst_30 = arith.constant 9.99999974E-6 : f32
    %56 = vector.broadcast %cst_30 : f32 to vector<128x1xf32>
    %57 = arith.addf %55, %56 : vector<128x1xf32>
    %58 = math.rsqrt %57 : vector<128x1xf32>
    %59 = vector.broadcast %14 : vector<1x128xf32> to vector<128x128xf32>
    %60 = vector.broadcast %58 : vector<128x1xf32> to vector<128x128xf32>
    %61 = arith.mulf %59, %60 : vector<128x128xf32>
    %62 = arith.addf %49, %61 : vector<128x128xf32>
    %63 = vector.broadcast %25 : vector<1x128xf32> to vector<128x128xf32>
    %64 = arith.mulf %48, %63 : vector<128x128xf32>
    %cst_31 = arith.constant dense<0.000000e+00> : vector<128xf32>
    %65 = vector.multi_reduction <add>, %64, %cst_31 [1] : vector<128x128xf32> to vector<128xf32>
    %66 = vector.shape_cast %65 : vector<128xf32> to vector<128x1xf32>
    %cst_32 = arith.constant 1.250000e-01 : f32
    %67 = vector.broadcast %cst_32 : f32 to vector<128x1xf32>
    %68 = arith.mulf %66, %67 : vector<128x1xf32>
    %cst_33 = arith.constant 9.99999974E-6 : f32
    %69 = vector.broadcast %cst_33 : f32 to vector<128x1xf32>
    %70 = arith.addf %68, %69 : vector<128x1xf32>
    %71 = math.rsqrt %70 : vector<128x1xf32>
    %72 = vector.broadcast %25 : vector<1x128xf32> to vector<128x128xf32>
    %73 = vector.broadcast %71 : vector<128x1xf32> to vector<128x128xf32>
    %74 = arith.mulf %72, %73 : vector<128x128xf32>
    %75 = arith.addf %62, %74 : vector<128x128xf32>
    %76 = vector.broadcast %36 : vector<1x128xf32> to vector<128x128xf32>
    %77 = arith.mulf %48, %76 : vector<128x128xf32>
    %cst_34 = arith.constant dense<0.000000e+00> : vector<128xf32>
    %78 = vector.multi_reduction <add>, %77, %cst_34 [1] : vector<128x128xf32> to vector<128xf32>
    %79 = vector.shape_cast %78 : vector<128xf32> to vector<128x1xf32>
    %cst_35 = arith.constant 1.250000e-01 : f32
    %80 = vector.broadcast %cst_35 : f32 to vector<128x1xf32>
    %81 = arith.mulf %79, %80 : vector<128x1xf32>
    %cst_36 = arith.constant 9.99999974E-6 : f32
    %82 = vector.broadcast %cst_36 : f32 to vector<128x1xf32>
    %83 = arith.addf %81, %82 : vector<128x1xf32>
    %84 = math.rsqrt %83 : vector<128x1xf32>
    %85 = vector.broadcast %36 : vector<1x128xf32> to vector<128x128xf32>
    %86 = vector.broadcast %84 : vector<128x1xf32> to vector<128x128xf32>
    %87 = arith.mulf %85, %86 : vector<128x128xf32>
    %88 = arith.addf %75, %87 : vector<128x128xf32>
    %89 = vector.broadcast %4 : vector<1x128xf32> to vector<128x128xf32>
    %90 = arith.mulf %88, %89 : vector<128x128xf32>
    %91 = arith.mulf %47, %90 : vector<128x128xf32>
    %92 = vector.broadcast %5 : vector<1x128xf32> to vector<128x128xf32>
    %93 = arith.addf %91, %92 : vector<128x128xf32>
    %cst_37 = arith.constant 5.000000e-01 : f32
    %94 = vector.broadcast %cst_37 : f32 to vector<128x128xf32>
    %95 = arith.mulf %94, %93 : vector<128x128xf32>
    %cst_38 = arith.constant 0.707106769 : f32
    %96 = vector.broadcast %cst_38 : f32 to vector<128x128xf32>
    %97 = arith.mulf %93, %96 : vector<128x128xf32>
    %98 = math.erf %97 : vector<128x128xf32>
    %cst_39 = arith.constant 1.000000e+00 : f32
    %99 = vector.broadcast %cst_39 : f32 to vector<128x128xf32>
    %100 = arith.addf %99, %98 : vector<128x128xf32>
    %101 = arith.mulf %95, %100 : vector<128x128xf32>
    %cst_40 = arith.constant dense<0.000000e+00> : vector<128x128xf32>
    %102 = tpu.matmul %101, %2, %cst_40 {dimension_numbers = #tpu.dot_dimension_numbers<[1], [0], [0], [1], [0, 0, 1, 1], [], []>} : vector<128x128xf32>, vector<128x128xf32>, vector<128x128xf32> -> vector<128x128xf32>
    %103 = vector.broadcast %6 : vector<1x128xf32> to vector<128x128xf32>
    %104 = arith.addf %102, %103 : vector<128x128xf32>
    %105 = vector.extract_strided_slice %104 {offsets = [0, 32], sizes = [128, 1], strides = [1, 1]} : vector<128x128xf32> to vector<128x1xf32>
    %106 = arith.negf %105 : vector<128x1xf32>
    %107 = math.exp %106 : vector<128x1xf32>
    %cst_41 = arith.constant 1.000000e+00 : f32
    %108 = vector.broadcast %cst_41 : f32 to vector<128x1xf32>
    %109 = arith.addf %108, %107 : vector<128x1xf32>
    %110 = arith.divf %108, %109 : vector<128x1xf32>
    %111 = vector.broadcast %9 : vector<1x128xf32> to vector<128x128xf32>
    %112 = arith.mulf %104, %111 : vector<128x128xf32>
    %cst_42 = arith.constant dense<0.000000e+00> : vector<128xf32>
    %113 = vector.multi_reduction <add>, %112, %cst_42 [1] : vector<128x128xf32> to vector<128xf32>
    %114 = vector.shape_cast %113 : vector<128xf32> to vector<128x1xf32>
    %cst_43 = arith.constant 3.125000e-02 : f32
    %115 = vector.broadcast %cst_43 : f32 to vector<128x1xf32>
    %116 = arith.mulf %114, %115 : vector<128x1xf32>
    %117 = vector.broadcast %116 : vector<128x1xf32> to vector<128x128xf32>
    %118 = arith.subf %104, %117 : vector<128x128xf32>
    %119 = vector.broadcast %9 : vector<1x128xf32> to vector<128x128xf32>
    %120 = arith.mulf %118, %119 : vector<128x128xf32>
    %121 = arith.mulf %120, %120 : vector<128x128xf32>
    %cst_44 = arith.constant dense<0.000000e+00> : vector<128xf32>
    %122 = vector.multi_reduction <add>, %121, %cst_44 [1] : vector<128x128xf32> to vector<128xf32>
    %123 = vector.shape_cast %122 : vector<128xf32> to vector<128x1xf32>
    %cst_45 = arith.constant 3.125000e-02 : f32
    %124 = vector.broadcast %cst_45 : f32 to vector<128x1xf32>
    %125 = arith.mulf %123, %124 : vector<128x1xf32>
    %cst_46 = arith.constant 9.99999974E-6 : f32
    %126 = vector.broadcast %cst_46 : f32 to vector<128x1xf32>
    %127 = arith.addf %125, %126 : vector<128x1xf32>
    %128 = math.rsqrt %127 : vector<128x1xf32>
    %129 = vector.broadcast %128 : vector<128x1xf32> to vector<128x128xf32>
    %130 = vector.broadcast %7 : vector<1x128xf32> to vector<128x128xf32>
    %131 = arith.mulf %129, %130 : vector<128x128xf32>
    %132 = arith.mulf %118, %131 : vector<128x128xf32>
    %133 = vector.broadcast %8 : vector<1x128xf32> to vector<128x128xf32>
    %134 = arith.addf %132, %133 : vector<128x128xf32>
    %cst_47 = arith.constant 5.000000e-01 : f32
    %135 = vector.broadcast %cst_47 : f32 to vector<128x128xf32>
    %136 = arith.mulf %135, %134 : vector<128x128xf32>
    %cst_48 = arith.constant 0.707106769 : f32
    %137 = vector.broadcast %cst_48 : f32 to vector<128x128xf32>
    %138 = arith.mulf %134, %137 : vector<128x128xf32>
    %139 = math.erf %138 : vector<128x128xf32>
    %cst_49 = arith.constant 1.000000e+00 : f32
    %140 = vector.broadcast %cst_49 : f32 to vector<128x128xf32>
    %141 = arith.addf %140, %139 : vector<128x128xf32>
    %142 = arith.mulf %136, %141 : vector<128x128xf32>
    %cst_50 = arith.constant 1.000000e+00 : f32
    %143 = vector.broadcast %cst_50 : f32 to vector<128x1xf32>
    %144 = arith.addf %143, %110 : vector<128x1xf32>
    %145 = vector.broadcast %144 : vector<128x1xf32> to vector<128x128xf32>
    %146 = arith.mulf %142, %145 : vector<128x128xf32>
    %c0_51 = arith.constant 0 : index
    %c0_52 = arith.constant 0 : index
    %147 = vector.load %arg6[%c0_51, %c0_52] : memref<128x128xf32, #tpu.memory_space<vmem>>, vector<128x128xf32>
    tpu.vector_store %arg6[%c0_51, %c0_52], %146 {strides = array<i32>} : memref<128x128xf32, #tpu.memory_space<vmem>>, vector<128x128xf32>,
    return
  }
  func.func @transform_0(%arg0: i32) -> (i32, i32) {
    %c0_i32 = arith.constant 0 : i32
    %c0_i32_0 = arith.constant 0 : i32
    return %arg0, %c0_i32 : i32, i32
  }
  func.func @transform_1(%arg0: i32) -> (i32, i32) {
    %c0_i32 = arith.constant 0 : i32
    %c0_i32_0 = arith.constant 0 : i32
    %c0_i32_1 = arith.constant 0 : i32
    return %c0_i32, %c0_i32_0 : i32, i32
  }
  func.func @transform_2(%arg0: i32) -> (i32, i32) {
    %c0_i32 = arith.constant 0 : i32
    %c0_i32_0 = arith.constant 0 : i32
    %c0_i32_1 = arith.constant 0 : i32
    return %c0_i32, %c0_i32_0 : i32, i32
  }
  func.func @transform_3(%arg0: i32) -> (i32, i32) {
    %c0_i32 = arith.constant 0 : i32
    %c0_i32_0 = arith.constant 0 : i32
    %c0_i32_1 = arith.constant 0 : i32
    return %c0_i32, %c0_i32_0 : i32, i32
  }
  func.func @transform_4(%arg0: i32) -> (i32, i32) {
    %c0_i32 = arith.constant 0 : i32
    %c0_i32_0 = arith.constant 0 : i32
    %c0_i32_1 = arith.constant 0 : i32
    return %c0_i32, %c0_i32_0 : i32, i32
  }
  func.func @transform_5(%arg0: i32) -> (i32, i32) {
    %c0_i32 = arith.constant 0 : i32
    %c0_i32_0 = arith.constant 0 : i32
    return %arg0, %c0_i32 : i32, i32
  }
}

</mosaic_0001>

<bundles_post_ra>
// kernel: tpu_custom_call.1
= control target key start
LH: loop header
LB: loop body
LE: loop exit
PB: predicated region body
PF: predicated region fallthrough
CT: control target
= control target key end

     0   :  { %10 = vsyncpa [#allocation3], 0  ;;  %s4092_s0 = inlined_call_operand.hbm [shape: f32[256,128], index: 0, kind: input, shape index: {}]   ;;  %s4093_s1 = inlined_call_operand.hbm [shape: f32[128,128], index: 1, kind: input, shape index: {}]   ;;  %s4094_s2 = inlined_call_operand.hbm [shape: f32[128,128], index: 2, kind: input, shape index: {}]   ;;  %s4095_s3 = inlined_call_operand.vmem [shape: f32[8,128], index: 3, kind: input, shape index: {}]   ;;  %s4096_s4 = inlined_call_operand.hbm [shape: f32[8,128], index: 4, kind: input, shape index: {}]   ;;  %s4097_s5 = inlined_call_operand.hbm [shape: f32[256,128], index: 5, kind: output, shape index: {}]  }
   0x1   :  { %12 = vsyncpa [#allocation3 + $0x1], 0 }
   0x2   :  { %13 = vsyncpa [#allocation6], 0 }
   0x3   :  { %14 = vsyncpa [#allocation9], 0 }
   0x4   :  { %15 = vsyncpa [#allocation4], 0 }
   0x5   :  { %17 = vsyncpa [#allocation4 + $0x1], 0  ;;  %s3028_s18 = smov 0   ;;  %s3030_s19 = smov 0  }
   0x6   :  { %s3032_s20 = smov 0   ;;  %s3034_s21 = smov 0  }
   0x7 LB: > { %s3049_s22 = sadd.s32 4294967295, %s2986_s21   ;;  %s2167_s23 = sadd.s32 4294967294, %s2986_s21   ;;  %s2986_s21 = sphi %s3034_s21, %s4120_s21   ;;  %s2982_s20 = sphi %s3032_s20, %s4119_s20   ;;  %s2978_s19 = sphi %s3030_s19, %s4118_s19   ;;  %s2974_s18 = sphi %s3028_s18, %s4117_s18  }
   0x8   : > { %p43_p0 = scmp.ne.s32.totalorder %s2978_s19, %s2974_s18  ;;  %p4098_p1 = scmp.eq.s32.totalorder %s3049_s22, 0 }
   0x9   : > { %p157_p3 = scmp.eq.s32.totalorder %s2167_s23, 1  ;;  %p2168_p5 = scmp.ge.s32.totalorder %s2986_s21, 1 }
   0xa   : > { %p3058_p4 = por %p4098_p1, %p43_p0  ;;  %p164_p7 = scmp.lt.s32.totalorder %s2986_s21, 3 }
   0xb   : > { %p3063_p6 = por %p157_p3, %p43_p0  ;;  %s2988_s27 = smov [#allocation5]  }
   0xc   : > { %s4101_s24 = scalar_select %p3058_p4, 1, 0 }
   0xd   : > { %s4102_s25 = scalar_select %p3063_p6, 1, 0 }
   0xe   : > { %p3068_p8 = pnand %p2168_p5, %p164_p7  ;;  %s176_s28 = sshll.u32 %s2988_s27, 4  ;;  %s3072_s28 = int_to_ptr.vmem [resolvable:$true] %s176_s28 }
   0xf   : > { %s2989_s30 = smov [#allocation7]   ;;  %s2990_s7 = smov [#allocation8]  }
  0x10   : > { %s4103_s26 = scalar_select %p3068_p8, 1, 0 }
  0x11   : > { %p2471_p9 = pneg %p3068_p8  ;;  %s189_s6 = sshll.u32 %s2989_s30, 4  ;;  %s3083_s6 = int_to_ptr.vmem [resolvable:$true] %s189_s6 }
  0x12   : > { %s3085_s8 = sshll.u32 %s2990_s7, 4  ;;  %s2798_s11 = scalar_lea.hbm %s4093_s1, 2048  ;;  %s207_s8 = int_to_ptr.vmem [resolvable:$true] %s3085_s8 }
  0x13   : > { %p3079_p11 = pnand %p2471_p9, %p4098_p1  ;;  %p2799_p12 = scmp.ne.s32.totalorder %s4093_s1, %s2798_s11 }
  0x14   : > { %p2805_p5 = scmp.lt.u32.totalorder %s2798_s11, %s4093_s1 }
  0x15   : > { %p3095_p13 = pneg %p3079_p11 }
  0x17   : > { %p2801_p0 = pnand %p3095_p13, %p2799_p12 }
  0x19   : > { %p2802_p3 = pneg %p2801_p0 }
  0x1b   : > { %p2807_p7 = pnand %p2805_p5, %p2802_p3 }
  0x1d   : > { %2810 = shalt.err (!%p2807_p7)
}
  0x1e   : > { %s2811_s17 = scalar_lea.vmem %s3072_s28, 2048  ;;  %p2819_p2 = scmp.lt.s32.totalorder %s3072_s28, %s3072_s28 }
  0x1f   : > { %p2812_p9 = scmp.ne.s32.totalorder %s3072_s28, %s2811_s17  ;;  %p2820_p6 = scmp.lt.s32.totalorder %s2811_s17, %s2811_s17 }
  0x21   : > { %p2814_p10 = pnand %p2812_p9, %p3095_p13  ;;  %p2821_p12 = por %p2820_p6, %p2819_p2 }
  0x23   : > { %p2815_p1 = pneg %p2814_p10 }
  0x25   : > { %p2822_p0 = pnand %p2821_p12, %p2815_p1 }
  0x27   : > { %2825 = shalt.err (!%p2822_p0)
}
  0x28   : > { %s2991_s23 = smov 128   ;;  %s2992_s27 = smov 8  }
  0x29   : > { %2474 = dma.hbm_to_vmem [thread:$0]  (!%p3079_p11), %s4093_s1, 2048, %s3072_s28, [#allocation6], %s2991_s23, %s2991_s23, %s2992_s27  }
  0x2a   : > { %s2826_s11 = scalar_lea.hbm %s4094_s2, 2048 }
  0x2b   : > { %p2827_p1 = scmp.ne.s32.totalorder %s4094_s2, %s2826_s11  ;;  %p2833_p10 = scmp.lt.u32.totalorder %s2826_s11, %s4094_s2 }
  0x2d   : > { %p2829_p2 = pnand %p2827_p1, %p3095_p13 }
  0x2f   : > { %p2830_p6 = pneg %p2829_p2 }
  0x31   : > { %p2835_p3 = pnand %p2833_p10, %p2830_p6 }
  0x33   : > { %2838 = shalt.err (!%p2835_p3)
}
  0x34   : > { %s2839_s28 = scalar_lea.vmem %s3083_s6, 2048  ;;  %p2847_p12 = scmp.lt.s32.totalorder %s3083_s6, %s3083_s6 }
  0x35   : > { %p2840_p5 = scmp.ne.s32.totalorder %s3083_s6, %s2839_s28  ;;  %p2848_p0 = scmp.lt.s32.totalorder %s2839_s28, %s2839_s28 }
  0x37   : > { %p2842_p7 = pnand %p2840_p5, %p3095_p13  ;;  %p2849_p1 = por %p2848_p0, %p2847_p12 }
  0x39   : > { %p2843_p9 = pneg %p2842_p7 }
  0x3b   : > { %p2850_p2 = pnand %p2849_p1, %p2843_p9 }
  0x3d   : > { %2853 = shalt.err (!%p2850_p2)
}
  0x3e   : > { %2477 = dma.hbm_to_vmem [thread:$0]  (!%p3079_p11), %s4094_s2, 2048, %s3083_s6, [#allocation6], %s2991_s23, %s2991_s23, %s2992_s27  }
  0x3f   : > { %s2854_s10 = scalar_lea.hbm %s4096_s4, 128 }
  0x40   : > { %p2855_p6 = scmp.ne.s32.totalorder %s4096_s4, %s2854_s10  ;;  %p2861_p5 = scmp.lt.u32.totalorder %s2854_s10, %s4096_s4 }
  0x42   : > { %p2857_p10 = pnand %p2855_p6, %p3095_p13 }
  0x44   : > { %p2858_p3 = pneg %p2857_p10 }
  0x46   : > { %p2863_p7 = pnand %p2861_p5, %p2858_p3 }
  0x48   : > { %2866 = shalt.err (!%p2863_p7)
}
  0x49   : > { %s2867_s16 = scalar_lea.vmem %s207_s8, 128  ;;  %p2875_p1 = scmp.lt.s32.totalorder %s207_s8, %s207_s8 }
  0x4a   : > { %p2868_p9 = scmp.ne.s32.totalorder %s207_s8, %s2867_s16  ;;  %p2876_p2 = scmp.lt.s32.totalorder %s2867_s16, %s2867_s16 }
  0x4c   : > { %p2870_p12 = pnand %p2868_p9, %p3095_p13  ;;  %p2877_p4 = por %p2876_p2, %p2875_p1 }
  0x4e   : > { %p2871_p0 = pneg %p2870_p12 }
  0x50   : > { %p2878_p8 = pnand %p2877_p4, %p2871_p0 }
  0x52   : > { %2881 = shalt.err (!%p2878_p8)
}
  0x53   : > { %2480 = dma.hbm_to_vmem [thread:$0]  (!%p3079_p11), %s4096_s4, 128, %s207_s8, [#allocation9]  }
  0x54   : > { %s3165_s14 = sadd.s32 1, %s2986_s21   ;;  %s30_s29 = sadd.s32 1, %s2982_s20 }
  0x55   : > { %s27_s17 = ssub.s32 %s2986_s21, %s3165_s14  ;;  %p37_p8 = scmp.ne.s32.totalorder %s2982_s20, %s2978_s19 }
  0x56   : > { %p28_p4 = scmp.eq.s32.totalorder %s27_s17, 0  ;;  %p38_p13 = scmp.eq.s32.totalorder %s2986_s21, 0 }
  0x57   : > { %p2492_p6 = scmp.lt.s32.totalorder %s2986_s21, 2  ;;  %p4106_p3 = scmp.eq.s32.totalorder %s3049_s22, 1 }
  0x58   : > { %s3175_s30 = scalar_select %p28_p4, %s2982_s20, %s30_s29  }
  0x59   : > { %p39_p10 = por %p38_p13, %p37_p8  ;;  %p3179_p5 = por %p4106_p3, %p37_p8 }
  0x5a   : > { %s217_s9 = sand.u32 1, %s2982_s20   ;;  %s2213_s10 = sshll.u32 %s2986_s21, 11 }
  0x5b   : > { %s2173_s8 = sshll.u32 %s217_s9, 7  ;;  %s3188_s13 = scalar_lea.hbm %s4092_s0, %s2213_s10 }
  0x5c   : > { %s221_s15 = scalar_lea.vmem [#allocation2], %s2173_s8  ;;  %p3190_p11 = pnand %p2492_p6, %p39_p10 }
  0x5d   : > { %s228_s16 = sshll.u32 %s221_s15, 4  ;;  %s3196_s28 = scalar_lea.sflag [#allocation3], %s217_s9  ;;  %s3194_s16 = int_to_ptr.vmem [resolvable:$true] %s228_s16 }
  0x5e   : > { %s2882_s17 = scalar_lea.hbm %s3188_s13, 2048  ;;  %p2884_p9 = pneg %p3190_p11 }
  0x5f   : > { %p2883_p7 = scmp.ne.s32.totalorder %s3188_s13, %s2882_s17  ;;  %s2887_s8 = scalar_lea.hbm %s4092_s0, 4096 }
  0x60   : > { %p2888_p1 = scmp.lt.u32.totalorder %s3188_s13, %s4092_s0  ;;  %p2889_p2 = scmp.lt.u32.totalorder %s2887_s8, %s2882_s17 }
  0x61   : > { %p2885_p12 = pnand %p2884_p9, %p2883_p7  ;;  %p2891_p8 = scmp.lt.u32.totalorder %s2882_s17, %s3188_s13 }
  0x62   : > { %p2890_p4 = por %p2889_p2, %p2888_p1 }
  0x63   : > { %p2886_p0 = pneg %p2885_p12 }
  0x64   : > { %p2892_p13 = por %p2891_p8, %p2890_p4 }
  0x66   : > { %p2893_p6 = pnand %p2892_p13, %p2886_p0 }
  0x68   : > { %2896 = shalt.err (!%p2893_p6)
}
  0x69   : > { %s2897_s9 = scalar_lea.vmem %s3194_s16, 2048  ;;  %s2993_s15 = smov [#allocation2]  }
  0x6a   : > { %p2898_p10 = scmp.ne.s32.totalorder %s3194_s16, %s2897_s9  ;;  %s2902_s29 = sshll.u32 %s2993_s15, 4  ;;  %s2903_s29 = int_to_ptr.vmem [resolvable:$false] %s2902_s29 }
  0x6b   : > { %s2904_s10 = scalar_lea.vmem %s2903_s29, 4096  ;;  %p2905_p12 = scmp.lt.s32.totalorder %s3194_s16, %s2903_s29 }
  0x6c   : > { %p2900_p3 = pnand %p2898_p10, %p2884_p9  ;;  %p2906_p1 = scmp.lt.s32.totalorder %s2904_s10, %s2897_s9 }
  0x6e   : > { %p2901_p7 = pneg %p2900_p3  ;;  %p2907_p2 = por %p2906_p1, %p2905_p12 }
  0x70   : > { %p2908_p4 = pnand %p2907_p2, %p2901_p7 }
  0x72   : > { %2911 = shalt.err (!%p2908_p4)
}
  0x73   : > { %2484 = dma.hbm_to_vmem [thread:$0]  (!%p3190_p11), %s3188_s13, 2048, %s3194_s16, %s3196_s28, %s2991_s23, %s2991_s23, %s2992_s27  }
  0x74   : > { %p4109_p9 = scmp.ne.s32.totalorder %s4103_s26, 0 }
  0x75   : > { %s3230_s17 = sand.u32 (!%p4109_p9), 1, %s2978_s19   ;;  %p4110_p0 = scmp.ne.s32.totalorder (!%p4109_p9), %s4101_s24, 0 }
  0x76   : > { %240 = sbr.rel (%p4109_p9) target bundleno = 1393 (0x571), region = 40  ;;  %s2177_s8 = sshll.u32 (!%p4109_p9), %s3230_s17, 7 }
  0x77   : > { %s243_s11 = scalar_lea.sflag (!%p4109_p9), [#allocation3], %s3230_s17  ;;  %s3236_s6 = scalar_lea.vmem (!%p4109_p9), [#allocation2], %s2177_s8 }
  0x7d   : > { %2957 = dma.done.wait (%p4110_p0), %s243_s11, 2048  }
  0x7e   : > { %2959 = vsyncadd (%p4110_p0), %s243_s11, 4294965248  ;;  %p4111_p11 = scmp.eq.s32.totalorder %s3049_s22, 0 }
  0x80   : > { %2961 = dma.done.wait (%p4111_p11), [#allocation6], 4096   ;;  %p4112_p8 = pmov %p4111_p11 }
  0x82   : > { %2963 = vsyncadd (%p4112_p8), [#allocation6], 4294963200  ;;  %p4113_p13 = pmov %p4112_p8 }
  0x83   : > { %p4114_p6 = pmov %p4112_p8 }
  0x84   : > { %2965 = dma.done.wait (%p4113_p13), [#allocation9], 128  }
  0x85   : > { %2967 = vsyncadd (%p4114_p6), [#allocation9], 4294967168  ;;  %v303_v0 = vld [vmem:[#allocation5] sm:$0xff]  ;;  %v304_v1 = vld [vmem:[#allocation5 + $0x8] sm:$0xff]  ;;  %s3995_s13 = scalar_lea.vmem [#allocation10], %s2177_s8  ;;  %s2214_s8 = sshll.u32 %s3049_s22, 11 }
  0x86   : > { %v305_v2 = vld [vmem:[#allocation5 + $0x10] sm:$0xff]  ;;  %v2391_v3 = vpack.c.bf16 %v304_v1, %v303_v0  ;;  %v306_v4 = vld [vmem:[#allocation5 + $0x18] sm:$0xff]  ;;  %v307_v6 = vld [vmem:[#allocation5 + $0x20] sm:$0xff]  ;;  %s2065_s16 = sshll.u32 %s3995_s13, 4  ;;  %s4045_s9 = scalar_lea.hbm %s4097_s5, %s2214_s8  ;;  %s4047_s16 = int_to_ptr.vmem [resolvable:$true] %s2065_s16 }
  0x87   : > { %v2395_v5 = vpack.c.bf16 %v306_v4, %v305_v2  ;;  %v308_v7 = vld [vmem:[#allocation5 + $0x28] sm:$0xff]  ;;  %v287_v9 = vld [vmem:[%s3236_s6] sm:$0xff]  ;;  %v309_v10 = vld [vmem:[#allocation5 + $0x30] sm:$0xff]  ;;  %s2052_s15 = scalar_lea.sflag [#allocation4], %s3230_s17  ;;  %s2912_s29 = scalar_lea.vmem %s4047_s16, 2048 }
  0x88   : > { %2392 = vmatprep.subr.bf16.mxu0 %v2391_v3  ;;  %v2399_v8 = vpack.c.bf16 %v308_v7, %v307_v6  ;;  %v310_v11 = vld [vmem:[#allocation5 + $0x38] sm:$0xff]  ;;  %2311 = vmatprep.mubr.f32.mxu0 %v287_v9  ;;  %v311_v13 = vld [vmem:[#allocation5 + $0x40] sm:$0xff]  ;;  %v312_v14 = vld [vmem:[#allocation5 + $0x48] sm:$0xff]  ;;  %p2913_p10 = scmp.ne.s32.totalorder %s4047_s16, %s2912_s29  ;;  %s2995_s22 = smov [#allocation10]  }
  0x89   : > { %2394 = vmatpush3.bf16.msra.mxu0 %v2391_v3  ;;  %v2403_v12 = vpack.c.bf16 %v310_v11, %v309_v10  ;;  %v2407_v15 = vpack.c.bf16 %v312_v14, %v311_v13  ;;  %v313_v16 = vld [vmem:[#allocation5 + $0x50] sm:$0xff]  ;;  %v314_v17 = vld [vmem:[#allocation5 + $0x58] sm:$0xff]  ;;  %v315_v19 = vld [vmem:[#allocation5 + $0x60] sm:$0xff]  ;;  %s2916_s10 = sshll.u32 %s2995_s22, 4  ;;  %s2917_s10 = int_to_ptr.vmem [resolvable:$false] %s2916_s10 }
  0x8a   : > { %2396 = vmatprep.subr.bf16.mxu0 %v2395_v5  ;;  %v2411_v18 = vpack.c.bf16 %v314_v17, %v313_v16  ;;  %v316_v20 = vld [vmem:[#allocation5 + $0x68] sm:$0xff]  ;;  %v317_v22 = vld [vmem:[#allocation5 + $0x70] sm:$0xff]  ;;  %v318_v23 = vld [vmem:[#allocation5 + $0x78] sm:$0xff]  ;;  %p2914_p3 = pnand %p2913_p10, %p3179_p5  ;;  %s2918_s11 = scalar_lea.vmem %s2917_s10, 4096 }
  0x8b   : > { %v2415_v21 = vpack.c.bf16 %v316_v20, %v315_v19  ;;  %v2419_v24 = vpack.c.bf16 %v318_v23, %v317_v22  ;;  %v288_v25 = vld [vmem:[%s3236_s6 + $0x8] sm:$0xff]  ;;  %v289_v26 = vld [vmem:[%s3236_s6 + $0x10] sm:$0xff]  ;;  %v290_v27 = vld [vmem:[%s3236_s6 + $0x18] sm:$0xff]  ;;  %p2919_p12 = scmp.lt.s32.totalorder %s4047_s16, %s2917_s10  ;;  %p2920_p1 = scmp.lt.s32.totalorder %s2918_s11, %s2912_s29 }
  0x8c   : > { %v291_v28 = vld [vmem:[%s3236_s6 + $0x20] sm:$0xff]  ;;  %v292_v29 = vld [vmem:[%s3236_s6 + $0x28] sm:$0xff]  ;;  %v293_v30 = vld [vmem:[%s3236_s6 + $0x30] sm:$0xff]  ;;  %p2915_p7 = pneg %p2914_p3 }
  0x8d   : > { %2398 = vmatpush3.bf16.msra.mxu0 %v2395_v5  ;;  %v294_v31 = vld [vmem:[%s3236_s6 + $0x38] sm:$0xff]  ;;  %v295_v32 = vld [vmem:[%s3236_s6 + $0x40] sm:$0xff]  ;;  %v296_v33 = vld [vmem:[%s3236_s6 + $0x48] sm:$0xff]  ;;  %p2921_p2 = por %p2920_p1, %p2919_p12 }
  0x8e   : > { %2400 = vmatprep.subr.bf16.mxu0 %v2399_v8  ;;  %v297_v34 = vld [vmem:[%s3236_s6 + $0x50] sm:$0xff]  ;;  %v298_v35 = vld [vmem:[%s3236_s6 + $0x58] sm:$0xff]  ;;  %v299_v36 = vld [vmem:[%s3236_s6 + $0x60] sm:$0xff] }
  0x8f   : > { %v300_v37 = vld [vmem:[%s3236_s6 + $0x68] sm:$0xff]  ;;  %v301_v38 = vld [vmem:[%s3236_s6 + $0x70] sm:$0xff]  ;;  %v302_v39 = vld [vmem:[%s3236_s6 + $0x78] sm:$0xff]  ;;  %p2922_p4 = pnand %p2921_p2, %p2915_p7 }
  0x90   : > { %v3269_v40 = vld [vmem:[%s4095_s3] ss:$0 sm:$0xff]  ;;  %v3274_v42 = vld [vmem:[%s4095_s3 + $0x3] ss:$0 sm:$0xff]  ;;  %v3289_v48 = vld [vmem:[%s4095_s3 + $0x4] ss:$0 sm:$0xff] }
  0x91   : > { %2402 = vmatpush3.bf16.msra.mxu0 %v2399_v8  ;;  %v3298_v53 = vld [vmem:[%s4095_s3 + $0x5] ss:$0 sm:$0xff] }
  0x92   : > { %2404 = vmatprep.subr.bf16.mxu0 %v2403_v12 }
  0x95   : > { %2406 = vmatpush3.bf16.msra.mxu0 %v2403_v12 }
  0x96   : > { %2408 = vmatprep.subr.bf16.mxu0 %v2407_v15 }
  0x99   : > { %2410 = vmatpush3.bf16.msra.mxu0 %v2407_v15 }
  0x9a   : > { %2412 = vmatprep.subr.bf16.mxu0 %v2411_v18 }
  0x9d   : > { %2414 = vmatpush3.bf16.msra.mxu0 %v2411_v18 }
  0x9e   : > { %2416 = vmatprep.subr.bf16.mxu0 %v2415_v21 }
  0xa1   : > { %2418 = vmatpush3.bf16.msra.mxu0 %v2415_v21 }
  0xa2   : > { %2420 = vmatprep.subr.bf16.mxu0 %v2419_v24 }
  0xa5   : > { %2422 = vmatpush3.bf16.msra.mxu0 %v2419_v24 }
  0xa8   : > { %2312 = vmatmul.mubr.f32.vlgmr.msra.gmra.mrb[0].mxu0 %v288_v25 }
  0xa9   : > { %2314 = vmatprep.mubr.f32.mxu0 %v289_v26 }
  0xac   : > { %2315 = vmatmul.mubr.f32.gmra.mrb[2].mxu0 %v290_v27 }
  0xad   : > { %2317 = vmatprep.mubr.f32.mxu0 %v291_v28 }
  0xb0   : > { %2318 = vmatmul.mubr.f32.gmra.mrb[4].mxu0 %v292_v29 }
  0xb1   : > { %2320 = vmatprep.mubr.f32.mxu0 %v293_v30 }
  0xb4   : > { %2321 = vmatmul.mubr.f32.gmra.mrb[6].mxu0 %v294_v31 }
  0xb5   : > { %2323 = vmatprep.mubr.f32.mxu0 %v295_v32 }
  0xb8   : > { %2324 = vmatmul.mubr.f32.gmra.mrb[8].mxu0 %v296_v33 }
  0xb9   : > { %2326 = vmatprep.mubr.f32.mxu0 %v297_v34 }
  0xbc   : > { %2327 = vmatmul.mubr.f32.gmra.mrb[10].mxu0 %v298_v35 }
  0xbd   : > { %2329 = vmatprep.mubr.f32.mxu0 %v299_v36 }
  0xc0   : > { %2330 = vmatmul.mubr.f32.gmra.mrb[12].mxu0 %v300_v37 }
  0xc1   : > { %2332 = vmatprep.mubr.f32.mxu0 %v301_v38 }
  0xc4   : > { %2333 = vmatmul.mubr.f32.gmra.mrb[14].mxu0 %v302_v39 }
 0x17b   : > { %v2313_v41 = vpop.f32.mrb[0].mxu0 }
 0x17c   : > { %v3277_v43 = vadd.f32 %v2313_v41, %v3269_v40  ;;  %v412_v44 = vpop.f32.mrb[1].mxu0 }
 0x17d   : > { %v3280_v45 = vadd.f32 %v3269_v40, %v412_v44 }
 0x17e   : > { %v497_v46 = vmul.f32 %v3274_v42, %v3277_v43  ;;  %v598_v51 = vmul.f32 %v3289_v48, %v3277_v43  ;;  %v699_v57 = vmul.f32 %v3298_v53, %v3277_v43 }
 0x17f   : > { %v496_v47 = vmul.f32 %v3274_v42, %v3280_v45  ;;  %v2316_v49 = vpop.f32.mrb[2].mxu0  ;;  %v597_v52 = vmul.f32 %v3289_v48, %v3280_v45  ;;  %v698_v58 = vmul.f32 %v3298_v53, %v3280_v45 }
 0x180   : > { %514 = vadd.xlane.f32.xlu1 %v497_v46  ;;  %v422_v50 = vpop.f32.mrb[3].mxu0  ;;  %v3301_v55 = vadd.f32 %v2316_v49, %v3269_v40 }
 0x181   : > { %512 = vadd.xlane.f32.xlu0 %v496_v47  ;;  %v3312_v63 = vadd.f32 %v3269_v40, %v422_v50 }
 0x182   : > { %v600_v60 = vmul.f32 %v3289_v48, %v3301_v55  ;;  %v499_v62 = vmul.f32 %v3274_v42, %v3301_v55  ;;  %v701_v2 = vmul.f32 %v3298_v53, %v3301_v55 }
 0x183   : > { %v2319_v54 = vpop.f32.mrb[4].mxu0  ;;  %v498_v3 = vmul.f32 %v3274_v42, %v3312_v63  ;;  %v599_v8 = vmul.f32 %v3289_v48, %v3312_v63  ;;  %v700_v9 = vmul.f32 %v3298_v53, %v3312_v63 }
 0x184   : > { %615 = vadd.xlane.f32.xlu1 %v598_v51  ;;  %v432_v56 = vpop.f32.mrb[5].mxu0  ;;  %v3319_v5 = vadd.f32 %v2319_v54, %v3269_v40 }
 0x185   : > { %613 = vadd.xlane.f32.xlu0 %v597_v52  ;;  %v3339_v16 = vadd.f32 %v3269_v40, %v432_v56 }
 0x186   : > { %v602_v11 = vmul.f32 %v3289_v48, %v3319_v5  ;;  %v501_v14 = vmul.f32 %v3274_v42, %v3319_v5  ;;  %v703_v21 = vmul.f32 %v3298_v53, %v3319_v5 }
 0x187   : > { %v2322_v59 = vpop.f32.mrb[6].mxu0  ;;  %v500_v22 = vmul.f32 %v3274_v42, %v3339_v16  ;;  %v601_v24 = vmul.f32 %v3289_v48, %v3339_v16  ;;  %v702_v25 = vmul.f32 %v3298_v53, %v3339_v16 }
 0x188   : > { %716 = vadd.xlane.f32.xlu1 %v699_v57  ;;  %v442_v61 = vpop.f32.mrb[7].mxu0  ;;  %v3352_v23 = vadd.f32 %v2322_v59, %v3269_v40 }
 0x189   : > { %714 = vadd.xlane.f32.xlu0 %v698_v58  ;;  %v3363_v28 = vadd.f32 %v3269_v40, %v442_v61 }
 0x18a   : > { %v604_v26 = vmul.f32 %v3289_v48, %v3352_v23  ;;  %v503_v27 = vmul.f32 %v3274_v42, %v3352_v23  ;;  %v705_v29 = vmul.f32 %v3298_v53, %v3352_v23 }
 0x18b   : > { %v2325_v0 = vpop.f32.mrb[8].mxu0  ;;  %v502_v30 = vmul.f32 %v3274_v42, %v3363_v28  ;;  %v603_v32 = vmul.f32 %v3289_v48, %v3363_v28  ;;  %v704_v33 = vmul.f32 %v3298_v53, %v3363_v28 }
 0x18c   : > { %619 = vadd.xlane.f32.xlu1 %v600_v60  ;;  %v452_v1 = vpop.f32.mrb[9].mxu0  ;;  %v3370_v31 = vadd.f32 %v2325_v0, %v3269_v40 }
 0x18d   : > { %518 = vadd.xlane.f32.xlu0 %v499_v62  ;;  %v3381_v36 = vadd.f32 %v3269_v40, %v452_v1 }
 0x18e   : > { %v606_v34 = vmul.f32 %v3289_v48, %v3370_v31  ;;  %v505_v35 = vmul.f32 %v3274_v42, %v3370_v31  ;;  %v707_v37 = vmul.f32 %v3298_v53, %v3370_v31 }
 0x18f   : > { %v2328_v4 = vpop.f32.mrb[10].mxu0  ;;  %v504_v38 = vmul.f32 %v3274_v42, %v3381_v36  ;;  %v605_v41 = vmul.f32 %v3289_v48, %v3381_v36  ;;  %v706_v44 = vmul.f32 %v3298_v53, %v3381_v36 }
 0x190   : > { %720 = vadd.xlane.f32.xlu1 %v701_v2  ;;  %v462_v6 = vpop.f32.mrb[11].mxu0  ;;  %v3388_v39 = vadd.f32 %v2328_v4, %v3269_v40 }
 0x191   : > { %516 = vadd.xlane.f32.xlu0 %v498_v3  ;;  %v3322_v7 = vadd.f32 %v3269_v40, %v462_v6 }
 0x192   : > { %v608_v46 = vmul.f32 %v3289_v48, %v3388_v39  ;;  %v507_v47 = vmul.f32 %v3274_v42, %v3388_v39 }
 0x193   : > { %v2331_v10 = vpop.f32.mrb[12].mxu0  ;;  %v506_v49 = vmul.f32 %v3274_v42, %v3322_v7  ;;  %v607_v50 = vmul.f32 %v3289_v48, %v3322_v7  ;;  %v708_v51 = vmul.f32 %v3298_v53, %v3322_v7 }
 0x194   : > { %617 = vadd.xlane.f32.xlu1 %v599_v8  ;;  %v3331_v12 = vadd.f32 %v2331_v10, %v3269_v40  ;;  %v472_v13 = vpop.f32.mrb[13].mxu0 }
 0x195   : > { %718 = vadd.xlane.f32.xlu0 %v700_v9  ;;  %v3336_v15 = vadd.f32 %v3269_v40, %v472_v13 }
 0x196   : > { %v610_v52 = vmul.f32 %v3289_v48, %v3331_v12  ;;  %v509_v54 = vmul.f32 %v3274_v42, %v3331_v12  ;;  %v711_v56 = vmul.f32 %v3298_v53, %v3331_v12 }
 0x197   : > { %v2334_v17 = vpop.f32.mrb[14].mxu0  ;;  %v508_v57 = vmul.f32 %v3274_v42, %v3336_v15  ;;  %v609_v58 = vmul.f32 %v3289_v48, %v3336_v15  ;;  %v710_v59 = vmul.f32 %v3298_v53, %v3336_v15 }
 0x198   : > { %623 = vadd.xlane.f32.xlu1 %v602_v11  ;;  %v3342_v18 = vadd.f32 %v2334_v17, %v3269_v40  ;;  %v482_v19 = vpop.f32.mrb[15].mxu0 }
 0x199   : > { %522 = vadd.xlane.f32.xlu0 %v501_v14  ;;  %v3345_v20 = vadd.f32 %v3269_v40, %v482_v19  ;;  %v709_v40 = vmul.f32 %v3298_v53, %v3388_v39 }
 0x19a   : > { %v612_v60 = vmul.f32 %v3289_v48, %v3342_v18  ;;  %v511_v61 = vmul.f32 %v3274_v42, %v3342_v18  ;;  %v713_v62 = vmul.f32 %v3298_v53, %v3342_v18 }
 0x19b   : > { %v510_v0 = vmul.f32 %v3274_v42, %v3345_v20  ;;  %v611_v1 = vmul.f32 %v3289_v48, %v3345_v20  ;;  %v712_v2 = vmul.f32 %v3298_v53, %v3345_v20 }
 0x19c   : > { %724 = vadd.xlane.f32.xlu1 %v703_v21 }
 0x19d   : > { %520 = vadd.xlane.f32.xlu0 %v500_v22 }
 0x1a0   : > { %621 = vadd.xlane.f32.xlu1 %v601_v24 }
 0x1a1   : > { %722 = vadd.xlane.f32.xlu0 %v702_v25 }
 0x1a4   : > { %627 = vadd.xlane.f32.xlu1 %v604_v26 }
 0x1a5   : > { %526 = vadd.xlane.f32.xlu0 %v503_v27 }
 0x1a8   : > { %728 = vadd.xlane.f32.xlu1 %v705_v29 }
 0x1a9   : > { %524 = vadd.xlane.f32.xlu0 %v502_v30 }
 0x1ac   : > { %625 = vadd.xlane.f32.xlu1 %v603_v32 }
 0x1ad   : > { %726 = vadd.xlane.f32.xlu0 %v704_v33 }
 0x1b0   : > { %631 = vadd.xlane.f32.xlu1 %v606_v34 }
 0x1b1   : > { %530 = vadd.xlane.f32.xlu0 %v505_v35 }
 0x1b4   : > { %732 = vadd.xlane.f32.xlu1 %v707_v37 }
 0x1b5   : > { %528 = vadd.xlane.f32.xlu0 %v504_v38 }
 0x1b8   : > { %629 = vadd.xlane.f32.xlu1 %v605_v41 }
 0x1b9   : > { %730 = vadd.xlane.f32.xlu0 %v706_v44 }
 0x1bc   : > { %635 = vadd.xlane.f32.xlu1 %v608_v46 }
 0x1bd   : > { %534 = vadd.xlane.f32.xlu0 %v507_v47 }
 0x1c0   : > { %736 = vadd.xlane.f32.xlu1 %v709_v40 }
 0x1c1   : > { %532 = vadd.xlane.f32.xlu0 %v506_v49 }
 0x1c4   : > { %633 = vadd.xlane.f32.xlu1 %v607_v50 }
 0x1c5   : > { %734 = vadd.xlane.f32.xlu0 %v708_v51 }
 0x1c8   : > { %639 = vadd.xlane.f32.xlu1 %v610_v52 }
 0x1c9   : > { %538 = vadd.xlane.f32.xlu0 %v509_v54 }
 0x1cc   : > { %740 = vadd.xlane.f32.xlu1 %v711_v56 }
 0x1cd   : > { %536 = vadd.xlane.f32.xlu0 %v508_v57 }
 0x1d0   : > { %637 = vadd.xlane.f32.xlu1 %v609_v58 }
 0x1d1   : > { %738 = vadd.xlane.f32.xlu0 %v710_v59 }
 0x1d4   : > { %643 = vadd.xlane.f32.xlu1 %v612_v60 }
 0x1d5   : > { %542 = vadd.xlane.f32.xlu0 %v511_v61 }
 0x1d8   : > { %744 = vadd.xlane.f32.xlu1 %v713_v62 }
 0x1d9   : > { %540 = vadd.xlane.f32.xlu0 %v510_v0 }
 0x1dc   : > { %641 = vadd.xlane.f32.xlu1 %v611_v1 }
 0x1dd   : > { %742 = vadd.xlane.f32.xlu0 %v712_v2 }
 0x20d   : > { %v515_v3 = vpop.xlane.xlu1 %514 }
 0x20e   : > { %v513_v4 = vpop.xlane.xlu0 %512  ;;  %v545_v8 = vmul.f32 0.0625, %v515_v3 }
 0x20f   : > { %v544_v11 = vmul.f32 0.0625, %v513_v4 }
 0x210   : > { %v561_v21 = vmul.f32 %v3274_v42, %v545_v8 }
 0x211   : > { %v616_v6 = vpop.xlane.xlu1 %615  ;;  %v560_v25 = vmul.f32 %v3274_v42, %v544_v11 }
 0x212   : > { %v646_v9 = vmul.f32 0.125, %v616_v6  ;;  %v614_v10 = vpop.xlane.xlu0 %613 }
 0x213   : > { %v645_v13 = vmul.f32 0.125, %v614_v10 }
 0x214   : > { %v662_v14 = vmul.f32 %v3289_v48, %v646_v9 }
 0x215   : > { %v661_v17 = vmul.f32 %v3289_v48, %v645_v13  ;;  %v717_v19 = vpop.xlane.xlu1 %716 }
 0x216   : > { %v747_v22 = vmul.f32 0.125, %v717_v19  ;;  %v715_v24 = vpop.xlane.xlu0 %714  ;;  %v678_v27 = vadd.f32 %v662_v14, %v561_v21 }
 0x217   : > { %v746_v26 = vmul.f32 0.125, %v715_v24  ;;  %v677_v30 = vadd.f32 %v661_v17, %v560_v25 }
 0x218   : > { %v763_v29 = vmul.f32 %v3298_v53, %v747_v22 }
 0x219   : > { %v762_v32 = vmul.f32 %v3298_v53, %v746_v26  ;;  %v620_v33 = vpop.xlane.xlu1 %619 }
 0x21a   : > { %v779_v34 = vadd.f32 %v763_v29, %v678_v27  ;;  %v648_v35 = vmul.f32 0.125, %v620_v33  ;;  %v519_v37 = vpop.xlane.xlu0 %518 }
 0x21b   : > { %v778_v38 = vadd.f32 %v762_v32, %v677_v30  ;;  %v547_v41 = vmul.f32 0.0625, %v519_v37 }
 0x21c   : > { %v3437_v44 = vsub.f32 %v3277_v43, %v779_v34  ;;  %v664_v46 = vmul.f32 %v3289_v48, %v648_v35 }
 0x21d   : > { %v3441_v47 = vsub.f32 %v3280_v45, %v778_v38  ;;  %v563_v40 = vmul.f32 %v3274_v42, %v547_v41  ;;  %v721_v49 = vpop.xlane.xlu1 %720 }
 0x21e   : > { %v749_v50 = vmul.f32 0.125, %v721_v49  ;;  %v517_v51 = vpop.xlane.xlu0 %516  ;;  %v811_v52 = vmul.f32 %v3437_v44, %v3437_v44 }
 0x21f   : > { %v680_v54 = vadd.f32 %v664_v46, %v563_v40  ;;  %v546_v56 = vmul.f32 0.0625, %v517_v51  ;;  %v810_v45 = vmul.f32 %v3441_v47, %v3441_v47 }
 0x220   : > { %v765_v57 = vmul.f32 %v3298_v53, %v749_v50  ;;  %v955_v43 = vmul.f32 %v3289_v48, %v811_v52  ;;  %v827_v58 = vmul.f32 %v3274_v42, %v811_v52  ;;  %v1083_v1 = vmul.f32 %v3298_v53, %v811_v52 }
 0x221   : > { %v618_v59 = vpop.xlane.xlu1 %617  ;;  %v562_v3 = vmul.f32 %v3274_v42, %v546_v56  ;;  %v826_v6 = vmul.f32 %v3274_v42, %v810_v45  ;;  %v954_v21 = vmul.f32 %v3289_v48, %v810_v45  ;;  %v1082_v22 = vmul.f32 %v3298_v53, %v810_v45 }
 0x222   : > { %v781_v60 = vadd.f32 %v765_v57, %v680_v54  ;;  %v647_v61 = vmul.f32 0.125, %v618_v59  ;;  %972 = vadd.xlane.f32.xlu1 %v955_v43  ;;  %844 = vadd.xlane.f32.xlu0 %v827_v58  ;;  %v719_v62 = vpop.xlane.xlu0 %718 }
 0x223   : > { %v748_v0 = vmul.f32 0.125, %v719_v62 }
 0x224   : > { %v3453_v2 = vsub.f32 %v3301_v55, %v781_v60  ;;  %v663_v4 = vmul.f32 %v3289_v48, %v647_v61 }
 0x225   : > { %v764_v8 = vmul.f32 %v3298_v53, %v748_v0  ;;  %v624_v9 = vpop.xlane.xlu1 %623 }
 0x226   : > { %v679_v10 = vadd.f32 %v663_v4, %v562_v3  ;;  %v650_v11 = vmul.f32 0.125, %v624_v9  ;;  %1100 = vadd.xlane.f32.xlu1 %v1083_v1  ;;  %842 = vadd.xlane.f32.xlu0 %v826_v6  ;;  %v523_v13 = vpop.xlane.xlu0 %522  ;;  %v813_v17 = vmul.f32 %v3453_v2, %v3453_v2 }
 0x227   : > { %v549_v14 = vmul.f32 0.0625, %v523_v13 }
 0x228   : > { %v780_v55 = vadd.f32 %v764_v8, %v679_v10  ;;  %v666_v19 = vmul.f32 %v3289_v48, %v650_v11  ;;  %v957_v32 = vmul.f32 %v3289_v48, %v813_v17  ;;  %v829_v35 = vmul.f32 %v3274_v42, %v813_v17 }
 0x229   : > { %v565_v24 = vmul.f32 %v3274_v42, %v549_v14  ;;  %v725_v25 = vpop.xlane.xlu1 %724  ;;  %v1085_v49 = vmul.f32 %v3298_v53, %v813_v17 }
 0x22a   : > { %v3466_v26 = vsub.f32 %v3312_v63, %v780_v55  ;;  %v751_v27 = vmul.f32 0.125, %v725_v25  ;;  %970 = vadd.xlane.f32.xlu1 %v954_v21  ;;  %1098 = vadd.xlane.f32.xlu0 %v1082_v22  ;;  %v521_v29 = vpop.xlane.xlu0 %520 }
 0x22b   : > { %v682_v30 = vadd.f32 %v666_v19, %v565_v24  ;;  %v548_v34 = vmul.f32 0.0625, %v521_v29 }
 0x22c   : > { %v767_v33 = vmul.f32 %v3298_v53, %v751_v27  ;;  %v812_v37 = vmul.f32 %v3466_v26, %v3466_v26 }
 0x22d   : > { %v622_v38 = vpop.xlane.xlu1 %621  ;;  %v564_v51 = vmul.f32 %v3274_v42, %v548_v34 }
 0x22e   : > { %v783_v41 = vadd.f32 %v767_v33, %v682_v30  ;;  %v649_v46 = vmul.f32 0.125, %v622_v38  ;;  %976 = vadd.xlane.f32.xlu1 %v957_v32  ;;  %848 = vadd.xlane.f32.xlu0 %v829_v35  ;;  %v723_v63 = vpop.xlane.xlu0 %722  ;;  %v828_v54 = vmul.f32 %v3274_v42, %v812_v37  ;;  %v956_v62 = vmul.f32 %v3289_v48, %v812_v37 }
 0x22f   : > { %v750_v40 = vmul.f32 0.125, %v723_v63  ;;  %v1084_v0 = vmul.f32 %v3298_v53, %v812_v37 }
 0x230   : > { %v3475_v50 = vsub.f32 %v3319_v5, %v783_v41  ;;  %v665_v52 = vmul.f32 %v3289_v48, %v649_v46 }
 0x231   : > { %v766_v56 = vmul.f32 %v3298_v53, %v750_v40  ;;  %v628_v57 = vpop.xlane.xlu1 %627 }
 0x232   : > { %v681_v43 = vadd.f32 %v665_v52, %v564_v51  ;;  %v652_v58 = vmul.f32 0.125, %v628_v57  ;;  %1104 = vadd.xlane.f32.xlu1 %v1085_v49  ;;  %846 = vadd.xlane.f32.xlu0 %v828_v54  ;;  %v527_v45 = vpop.xlane.xlu0 %526  ;;  %v815_v60 = vmul.f32 %v3475_v50, %v3475_v50 }
 0x233   : > { %v551_v59 = vmul.f32 0.0625, %v527_v45  ;;  %v319_v45 = vld [vmem:[#allocation7] sm:$0xff] }
 0x234   : > { %v782_v5 = vadd.f32 %v766_v56, %v681_v43  ;;  %v668_v61 = vmul.f32 %v3289_v48, %v652_v58  ;;  %v959_v10 = vmul.f32 %v3289_v48, %v815_v60  ;;  %v831_v14 = vmul.f32 %v3274_v42, %v815_v60 }
 0x235   : > { %v567_v1 = vmul.f32 %v3274_v42, %v551_v59  ;;  %v729_v3 = vpop.xlane.xlu1 %728  ;;  %v1087_v24 = vmul.f32 %v3298_v53, %v815_v60  ;;  %v320_v59 = vld [vmem:[#allocation7 + $0x8] sm:$0xff] }
 0x236   : > { %v3488_v4 = vsub.f32 %v3339_v16, %v782_v5  ;;  %v753_v6 = vmul.f32 0.125, %v729_v3  ;;  %974 = vadd.xlane.f32.xlu1 %v956_v62  ;;  %1102 = vadd.xlane.f32.xlu0 %v1084_v0  ;;  %v525_v8 = vpop.xlane.xlu0 %524  ;;  %v2423_v62 = vpack.c.bf16 %v320_v59, %v319_v45 }
 0x237   : > { %v684_v9 = vadd.f32 %v668_v61, %v567_v1  ;;  %v550_v13 = vmul.f32 0.0625, %v525_v8 }
 0x238   : > { %v769_v11 = vmul.f32 %v3298_v53, %v753_v6  ;;  %v814_v17 = vmul.f32 %v3488_v4, %v3488_v4  ;;  %2424 = vmatprep.subr.bf16.mxu1 %v2423_v62 }
 0x239   : > { %v626_v55 = vpop.xlane.xlu1 %625  ;;  %v566_v27 = vmul.f32 %v3274_v42, %v550_v13  ;;  %2426 = vmatpush3.bf16.msra.mxu1 %v2423_v62 }
 0x23a   : > { %v785_v19 = vadd.f32 %v769_v11, %v684_v9  ;;  %v651_v21 = vmul.f32 0.125, %v626_v55  ;;  %980 = vadd.xlane.f32.xlu1 %v959_v10  ;;  %852 = vadd.xlane.f32.xlu0 %v831_v14  ;;  %v727_v16 = vpop.xlane.xlu0 %726  ;;  %v830_v30 = vmul.f32 %v3274_v42, %v814_v17  ;;  %v958_v63 = vmul.f32 %v3289_v48, %v814_v17  ;;  %v321_v10 = vld [vmem:[#allocation7 + $0x10] sm:$0xff]  ;;  %v322_v11 = vld [vmem:[#allocation7 + $0x18] sm:$0xff] }
 0x23b   : > { %v752_v22 = vmul.f32 0.125, %v727_v16  ;;  %v1086_v40 = vmul.f32 %v3298_v53, %v814_v17  ;;  %v2427_v55 = vpack.c.bf16 %v322_v11, %v321_v10 }
 0x23c   : > { %v3497_v25 = vsub.f32 %v3352_v23, %v785_v19  ;;  %v667_v29 = vmul.f32 %v3289_v48, %v651_v21 }
 0x23d   : > { %v768_v32 = vmul.f32 %v3298_v53, %v752_v22  ;;  %v632_v33 = vpop.xlane.xlu1 %631  ;;  %2428 = vmatprep.subr.bf16.mxu1 %v2427_v55 }
 0x23e   : > { %v683_v34 = vadd.f32 %v667_v29, %v566_v27  ;;  %v654_v35 = vmul.f32 0.125, %v632_v33  ;;  %1108 = vadd.xlane.f32.xlu1 %v1087_v24  ;;  %850 = vadd.xlane.f32.xlu0 %v830_v30  ;;  %v531_v37 = vpop.xlane.xlu0 %530  ;;  %v817_v41 = vmul.f32 %v3497_v25, %v3497_v25  ;;  %v324_v30 = vld [vmem:[#allocation7 + $0x28] sm:$0xff] }
 0x23f   : > { %v553_v38 = vmul.f32 0.0625, %v531_v37  ;;  %2430 = vmatpush3.bf16.msra.mxu1 %v2427_v55 }
 0x240   : > { %v784_v23 = vadd.f32 %v768_v32, %v683_v34  ;;  %v670_v46 = vmul.f32 %v3289_v48, %v654_v35  ;;  %v961_v58 = vmul.f32 %v3289_v48, %v817_v41  ;;  %v833_v5 = vmul.f32 %v3274_v42, %v817_v41 }
 0x241   : > { %v569_v49 = vmul.f32 %v3274_v42, %v553_v38  ;;  %v733_v51 = vpop.xlane.xlu1 %732  ;;  %v1089_v9 = vmul.f32 %v3298_v53, %v817_v41 }
 0x242   : > { %v3510_v52 = vsub.f32 %v3363_v28, %v784_v23  ;;  %v755_v54 = vmul.f32 0.125, %v733_v51  ;;  %978 = vadd.xlane.f32.xlu1 %v958_v63  ;;  %1106 = vadd.xlane.f32.xlu0 %v1086_v40  ;;  %v529_v56 = vpop.xlane.xlu0 %528 }
 0x243   : > { %v686_v57 = vadd.f32 %v670_v46, %v569_v49  ;;  %v552_v43 = vmul.f32 0.0625, %v529_v56  ;;  %v326_v56 = vld [vmem:[#allocation7 + $0x38] sm:$0xff] }
 0x244   : > { %v771_v60 = vmul.f32 %v3298_v53, %v755_v54  ;;  %v816_v61 = vmul.f32 %v3510_v52, %v3510_v52  ;;  %v325_v54 = vld [vmem:[#allocation7 + $0x30] sm:$0xff] }
 0x245   : > { %v630_v28 = vpop.xlane.xlu1 %629  ;;  %v568_v6 = vmul.f32 %v3274_v42, %v552_v43 }
 0x246   : > { %v787_v0 = vadd.f32 %v771_v60, %v686_v57  ;;  %v653_v1 = vmul.f32 0.125, %v630_v28  ;;  %984 = vadd.xlane.f32.xlu1 %v961_v58  ;;  %856 = vadd.xlane.f32.xlu0 %v833_v5  ;;  %v731_v3 = vpop.xlane.xlu0 %730  ;;  %v832_v17 = vmul.f32 %v3274_v42, %v816_v61  ;;  %v960_v34 = vmul.f32 %v3289_v48, %v816_v61 }
 0x247   : > { %v754_v8 = vmul.f32 0.125, %v731_v3  ;;  %v1088_v35 = vmul.f32 %v3298_v53, %v816_v61 }
 0x248   : > { %v3520_v13 = vsub.f32 %v3370_v31, %v787_v0  ;;  %v669_v14 = vmul.f32 %v3289_v48, %v653_v1  ;;  %v323_v31 = vld [vmem:[#allocation7 + $0x20] sm:$0xff]  ;;  %v328_v1 = vld [vmem:[#allocation7 + $0x48] sm:$0xff] }
 0x249   : > { %v770_v19 = vmul.f32 %v3298_v53, %v754_v8  ;;  %v636_v21 = vpop.xlane.xlu1 %635  ;;  %v2431_v41 = vpack.c.bf16 %v324_v30, %v323_v31  ;;  %v327_v0 = vld [vmem:[#allocation7 + $0x40] sm:$0xff] }
 0x24a   : > { %v685_v16 = vadd.f32 %v669_v14, %v568_v6  ;;  %v656_v22 = vmul.f32 0.125, %v636_v21  ;;  %1112 = vadd.xlane.f32.xlu1 %v1089_v9  ;;  %854 = vadd.xlane.f32.xlu0 %v832_v17  ;;  %v535_v24 = vpop.xlane.xlu0 %534  ;;  %v819_v29 = vmul.f32 %v3520_v13, %v3520_v13  ;;  %v2439_v9 = vpack.c.bf16 %v328_v1, %v327_v0 }
 0x24b   : > { %v555_v27 = vmul.f32 0.0625, %v535_v24  ;;  %2432 = vmatprep.subr.bf16.mxu1 %v2431_v41 }
 0x24c   : > { %v786_v32 = vadd.f32 %v770_v19, %v685_v16  ;;  %v672_v33 = vmul.f32 %v3289_v48, %v656_v22  ;;  %v963_v51 = vmul.f32 %v3289_v48, %v819_v29  ;;  %v835_v43 = vmul.f32 %v3274_v42, %v819_v29  ;;  %2434 = vmatpush3.bf16.msra.mxu1 %v2431_v41  ;;  %v330_v16 = vld [vmem:[#allocation7 + $0x58] sm:$0xff] }
 0x24d   : > { %v571_v37 = vmul.f32 %v3274_v42, %v555_v27  ;;  %v737_v38 = vpop.xlane.xlu1 %736  ;;  %v1091_v28 = vmul.f32 %v3298_v53, %v819_v29 }
 0x24e   : > { %v3532_v23 = vsub.f32 %v3381_v36, %v786_v32  ;;  %v757_v46 = vmul.f32 0.125, %v737_v38  ;;  %982 = vadd.xlane.f32.xlu1 %v960_v34  ;;  %1110 = vadd.xlane.f32.xlu0 %v1088_v35  ;;  %v533_v63 = vpop.xlane.xlu0 %532  ;;  %v2435_v36 = vpack.c.bf16 %v326_v56, %v325_v54 }
 0x24f   : > { %v688_v40 = vadd.f32 %v672_v33, %v571_v37  ;;  %v554_v49 = vmul.f32 0.0625, %v533_v63  ;;  %v332_v63 = vld [vmem:[#allocation7 + $0x68] sm:$0xff] }
 0x250   : > { %v773_v57 = vmul.f32 %v3298_v53, %v757_v46  ;;  %v818_v58 = vmul.f32 %v3532_v23, %v3532_v23  ;;  %2436 = vmatprep.subr.bf16.mxu1 %v2435_v36  ;;  %v331_v46 = vld [vmem:[#allocation7 + $0x60] sm:$0xff] }
 0x251   : > { %v634_v45 = vpop.xlane.xlu1 %633  ;;  %v570_v61 = vmul.f32 %v3274_v42, %v554_v49  ;;  %2438 = vmatpush3.bf16.msra.mxu1 %v2435_v36 }
 0x252   : > { %v789_v59 = vadd.f32 %v773_v57, %v688_v40  ;;  %v655_v60 = vmul.f32 0.125, %v634_v45  ;;  %988 = vadd.xlane.f32.xlu1 %v963_v51  ;;  %860 = vadd.xlane.f32.xlu0 %v835_v43  ;;  %v735_v5 = vpop.xlane.xlu0 %734  ;;  %v834_v8 = vmul.f32 %v3274_v42, %v818_v58  ;;  %v962_v27 = vmul.f32 %v3289_v48, %v818_v58 }
 0x253   : > { %v756_v62 = vmul.f32 0.125, %v735_v5  ;;  %2440 = vmatprep.subr.bf16.mxu1 %v2439_v9  ;;  %v1090_v29 = vmul.f32 %v3298_v53, %v818_v58 }
 0x254   : > { %v3542_v3 = vsub.f32 %v3388_v39, %v789_v59  ;;  %v671_v6 = vmul.f32 %v3289_v48, %v655_v60  ;;  %v329_v39 = vld [vmem:[#allocation7 + $0x50] sm:$0xff]  ;;  %v334_v60 = vld [vmem:[#allocation7 + $0x78] sm:$0xff] }
 0x255   : > { %v772_v10 = vmul.f32 %v3298_v53, %v756_v62  ;;  %v640_v11 = vpop.xlane.xlu1 %639  ;;  %2442 = vmatpush3.bf16.msra.mxu1 %v2439_v9  ;;  %v2443_v32 = vpack.c.bf16 %v330_v16, %v329_v39  ;;  %v333_v59 = vld [vmem:[#allocation7 + $0x70] sm:$0xff] }
 0x256   : > { %v687_v14 = vadd.f32 %v671_v6, %v570_v61  ;;  %v658_v17 = vmul.f32 0.125, %v640_v11  ;;  %1116 = vadd.xlane.f32.xlu1 %v1091_v28  ;;  %858 = vadd.xlane.f32.xlu0 %v834_v8  ;;  %v539_v55 = vpop.xlane.xlu0 %538  ;;  %v821_v21 = vmul.f32 %v3542_v3, %v3542_v3  ;;  %v2451_v28 = vpack.c.bf16 %v334_v60, %v333_v59 }
 0x257   : > { %v557_v19 = vmul.f32 0.0625, %v539_v55  ;;  %2444 = vmatprep.subr.bf16.mxu1 %v2443_v32 }
 0x258   : > { %v788_v22 = vadd.f32 %v772_v10, %v687_v14  ;;  %v674_v24 = vmul.f32 %v3289_v48, %v658_v17  ;;  %v965_v41 = vmul.f32 %v3289_v48, %v821_v21  ;;  %v837_v49 = vmul.f32 %v3274_v42, %v821_v21 }
 0x259   : > { %v573_v31 = vmul.f32 %v3274_v42, %v557_v19  ;;  %v741_v30 = vpop.xlane.xlu1 %740  ;;  %2446 = vmatpush3.bf16.msra.mxu1 %v2443_v32  ;;  %v1093_v45 = vmul.f32 %v3298_v53, %v821_v21 }
 0x25a   : > { %v3554_v33 = vsub.f32 %v3322_v7, %v788_v22  ;;  %v759_v34 = vmul.f32 0.125, %v741_v30  ;;  %986 = vadd.xlane.f32.xlu1 %v962_v27  ;;  %1114 = vadd.xlane.f32.xlu0 %v1090_v29  ;;  %v537_v35 = vpop.xlane.xlu0 %536  ;;  %v2447_v7 = vpack.c.bf16 %v332_v63, %v331_v46 }
 0x25b   : > { %v690_v37 = vadd.f32 %v674_v24, %v573_v31  ;;  %v556_v38 = vmul.f32 0.0625, %v537_v35 }
 0x25c   : > { %v775_v40 = vmul.f32 %v3298_v53, %v759_v34  ;;  %v820_v51 = vmul.f32 %v3554_v33, %v3554_v33  ;;  %2448 = vmatprep.subr.bf16.mxu1 %v2447_v7 }
 0x25d   : > { %v638_v54 = vpop.xlane.xlu1 %637  ;;  %v572_v58 = vmul.f32 %v3274_v42, %v556_v38  ;;  %2450 = vmatpush3.bf16.msra.mxu1 %v2447_v7 }
 0x25e   : > { %v791_v56 = vadd.f32 %v775_v40, %v690_v37  ;;  %v657_v57 = vmul.f32 0.125, %v638_v54  ;;  %992 = vadd.xlane.f32.xlu1 %v965_v41  ;;  %864 = vadd.xlane.f32.xlu0 %v837_v49  ;;  %v739_v43 = vpop.xlane.xlu0 %738  ;;  %v836_v62 = vmul.f32 %v3274_v42, %v820_v51  ;;  %v964_v17 = vmul.f32 %v3289_v48, %v820_v51 }
 0x25f   : > { %v758_v36 = vmul.f32 0.125, %v739_v43  ;;  %2452 = vmatprep.subr.bf16.mxu1 %v2451_v28  ;;  %v1092_v55 = vmul.f32 %v3298_v53, %v820_v51 }
 0x260   : > { %v3564_v5 = vsub.f32 %v3331_v12, %v791_v56  ;;  %v673_v61 = vmul.f32 %v3289_v48, %v657_v57 }
 0x261   : > { %v774_v0 = vmul.f32 %v3298_v53, %v758_v36  ;;  %v644_v1 = vpop.xlane.xlu1 %643  ;;  %2454 = vmatpush3.bf16.msra.mxu1 %v2451_v28 }
 0x262   : > { %v689_v6 = vadd.f32 %v673_v61, %v572_v58  ;;  %v660_v8 = vmul.f32 0.125, %v644_v1  ;;  %1120 = vadd.xlane.f32.xlu1 %v1093_v45  ;;  %862 = vadd.xlane.f32.xlu0 %v836_v62  ;;  %v543_v9 = vpop.xlane.xlu0 %542  ;;  %v823_v11 = vmul.f32 %v3564_v5, %v3564_v5 }
 0x263   : > { %v559_v10 = vmul.f32 0.0625, %v543_v9 }
 0x264   : > { %v790_v12 = vadd.f32 %v774_v0, %v689_v6  ;;  %v676_v14 = vmul.f32 %v3289_v48, %v660_v8  ;;  %v967_v27 = vmul.f32 %v3289_v48, %v823_v11  ;;  %v839_v30 = vmul.f32 %v3274_v42, %v823_v11 }
 0x265   : > { %v575_v19 = vmul.f32 %v3274_v42, %v559_v10  ;;  %v745_v21 = vpop.xlane.xlu1 %744  ;;  %v1095_v41 = vmul.f32 %v3298_v53, %v823_v11 }
 0x266   : > { %v3576_v39 = vsub.f32 %v3336_v15, %v790_v12  ;;  %v761_v16 = vmul.f32 0.125, %v745_v21  ;;  %990 = vadd.xlane.f32.xlu1 %v964_v17  ;;  %1118 = vadd.xlane.f32.xlu0 %v1092_v55  ;;  %v541_v22 = vpop.xlane.xlu0 %540 }
 0x267   : > { %v692_v24 = vadd.f32 %v676_v14, %v575_v19  ;;  %v558_v31 = vmul.f32 0.0625, %v541_v22 }
 0x268   : > { %v777_v29 = vmul.f32 %v3298_v53, %v761_v16  ;;  %v822_v32 = vmul.f32 %v3576_v39, %v3576_v39 }
 0x269   : > { %v642_v34 = vpop.xlane.xlu1 %641  ;;  %v574_v63 = vmul.f32 %v3274_v42, %v558_v31 }
 0x26a   : > { %v793_v35 = vadd.f32 %v777_v29, %v692_v24  ;;  %v659_v37 = vmul.f32 0.125, %v642_v34  ;;  %996 = vadd.xlane.f32.xlu1 %v967_v27  ;;  %868 = vadd.xlane.f32.xlu0 %v839_v30  ;;  %v743_v15 = vpop.xlane.xlu0 %742  ;;  %v838_v49 = vmul.f32 %v3274_v42, %v822_v32  ;;  %v966_v56 = vmul.f32 %v3289_v48, %v822_v32 }
 0x26b   : > { %v760_v38 = vmul.f32 0.125, %v743_v15  ;;  %v1094_v57 = vmul.f32 %v3298_v53, %v822_v32 }
 0x26c   : > { %v3585_v46 = vsub.f32 %v3342_v18, %v793_v35  ;;  %v675_v40 = vmul.f32 %v3289_v48, %v659_v37 }
 0x26d   : > { %v776_v51 = vmul.f32 %v3298_v53, %v760_v38 }
 0x26e   : > { %v691_v7 = vadd.f32 %v675_v40, %v574_v63  ;;  %1124 = vadd.xlane.f32.xlu1 %v1095_v41  ;;  %866 = vadd.xlane.f32.xlu0 %v838_v49  ;;  %v825_v18 = vmul.f32 %v3585_v46, %v3585_v46 }
 0x270   : > { %v792_v54 = vadd.f32 %v776_v51, %v691_v7  ;;  %v969_v58 = vmul.f32 %v3289_v48, %v825_v18  ;;  %v841_v36 = vmul.f32 %v3274_v42, %v825_v18 }
 0x272   : > { %v3596_v43 = vsub.f32 %v3345_v20, %v792_v54  ;;  %994 = vadd.xlane.f32.xlu1 %v966_v56  ;;  %1122 = vadd.xlane.f32.xlu0 %v1094_v57  ;;  %v1097_v20 = vmul.f32 %v3298_v53, %v825_v18 }
 0x274   : > { %v824_v45 = vmul.f32 %v3596_v43, %v3596_v43 }
 0x276   : > { %1000 = vadd.xlane.f32.xlu1 %v969_v58  ;;  %872 = vadd.xlane.f32.xlu0 %v841_v36  ;;  %v968_v59 = vmul.f32 %v3289_v48, %v824_v45  ;;  %v840_v60 = vmul.f32 %v3274_v42, %v824_v45  ;;  %v1096_v61 = vmul.f32 %v3298_v53, %v824_v45 }
 0x27a   : > { %998 = vadd.xlane.f32.xlu1 %v968_v59  ;;  %870 = vadd.xlane.f32.xlu0 %v840_v60 }
 0x27e   : > { %1128 = vadd.xlane.f32.xlu1 %v1097_v20  ;;  %1126 = vadd.xlane.f32.xlu0 %v1096_v61 }
 0x2af   : > { %v973_v62 = vpop.xlane.xlu1 %972  ;;  %v845_v28 = vpop.xlane.xlu0 %844 }
 0x2b0   : > { %v1003_v0 = vmul.f32 0.125, %v973_v62  ;;  %v875_v1 = vmul.f32 0.0625, %v845_v28 }
 0x2b2   : > { %v1019_v6 = vadd.f32 1e-05, %v1003_v0  ;;  %v891_v8 = vadd.f32 1e-05, %v875_v1  ;;  %v3623_v0 = vld [vmem:[%s4095_s3 + $0x4] ss:$0 sm:$0xff] }
 0x2b3   : > { %v1101_v9 = vpop.xlane.xlu1 %1100  ;;  %v843_v10 = vpop.xlane.xlu0 %842 }
 0x2b4   : > { %2539 = vrsqrt.f32 %v1019_v6  ;;  %v1131_v11 = vmul.f32 0.125, %v1101_v9  ;;  %v874_v12 = vmul.f32 0.0625, %v843_v10 }
 0x2b5   : > { %2541 = vrsqrt.f32 %v891_v8 }
 0x2b6   : > { %v1147_v14 = vadd.f32 1e-05, %v1131_v11  ;;  %v890_v17 = vadd.f32 1e-05, %v874_v12  ;;  %v3630_v12 = vld [vmem:[%s4095_s3 + $0x2] ss:$0 sm:$0xff] }
 0x2b7   : > { %v971_v55 = vpop.xlane.xlu1 %970  ;;  %v1099_v19 = vpop.xlane.xlu0 %1098 }
 0x2b8   : > { %2543 = vrsqrt.f32 %v1147_v14  ;;  %v1002_v21 = vmul.f32 0.125, %v971_v55  ;;  %v1130_v16 = vmul.f32 0.125, %v1099_v19 }
 0x2b9   : > { %2545 = vrsqrt.f32 %v890_v17  ;;  %v3635_v17 = vld [vmem:[%s4095_s3 + $0x5] ss:$0 sm:$0xff] }
 0x2ba   : > { %v1018_v22 = vadd.f32 1e-05, %v1002_v21  ;;  %v1146_v24 = vadd.f32 1e-05, %v1130_v16 }
 0x2bb   : > { %v977_v27 = vpop.xlane.xlu1 %976  ;;  %v849_v29 = vpop.xlane.xlu0 %848 }
 0x2bc   : > { %2547 = vrsqrt.f32 %v1018_v22  ;;  %v1005_v31 = vmul.f32 0.125, %v977_v27  ;;  %v877_v30 = vmul.f32 0.0625, %v849_v29 }
 0x2bd   : > { %2549 = vrsqrt.f32 %v1146_v24 }
 0x2be   : > { %v2540_v32 = vpop.eup %2539  ;;  %v1021_v34 = vadd.f32 1e-05, %v1005_v31  ;;  %v893_v35 = vadd.f32 1e-05, %v877_v30 }
 0x2bf   : > { %v2542_v37 = vpop.eup %2541  ;;  %v1051_v15 = vmul.f32 %v2540_v32, %v3289_v48  ;;  %v1105_v38 = vpop.xlane.xlu1 %1104 }
 0x2c0   : > { %v847_v41 = vpop.xlane.xlu0 %846  ;;  %v923_v63 = vmul.f32 %v2542_v37, %v3274_v42  ;;  %2551 = vrsqrt.f32 %v1021_v34  ;;  %v1133_v40 = vmul.f32 0.125, %v1105_v38  ;;  %v3612_v42 = vld [vmem:[%s4095_s3 + $0x1] ss:$0 sm:$0xff] }
 0x2c1   : > { %v876_v49 = vmul.f32 0.0625, %v847_v41  ;;  %2553 = vrsqrt.f32 %v893_v35 }
 0x2c2   : > { %v2544_v51 = vpop.eup %2543  ;;  %v1149_v7 = vadd.f32 1e-05, %v1133_v40  ;;  %v1067_v56 = vadd.f32 %v1051_v15, %v923_v63 }
 0x2c3   : > { %v892_v54 = vadd.f32 1e-05, %v876_v49  ;;  %v1179_v57 = vmul.f32 %v2544_v51, %v3298_v53  ;;  %v975_v18 = vpop.xlane.xlu1 %974  ;;  %v2546_v36 = vpop.eup %2545  ;;  %v3617_v53 = vld [vmem:[%s4095_s3 + $0x3] ss:$0 sm:$0xff] }
 0x2c4   : > { %v1103_v58 = vpop.xlane.xlu0 %1102  ;;  %2555 = vrsqrt.f32 %v1149_v7  ;;  %v1004_v45 = vmul.f32 0.125, %v975_v18  ;;  %v922_v28 = vmul.f32 %v3617_v53, %v2546_v36 }
 0x2c5   : > { %v1132_v48 = vmul.f32 0.125, %v1103_v58  ;;  %v1195_v59 = vadd.f32 %v1179_v57, %v1067_v56  ;;  %2557 = vrsqrt.f32 %v892_v54 }
 0x2c6   : > { %v2548_v60 = vpop.eup %2547  ;;  %v1020_v20 = vadd.f32 1e-05, %v1004_v45 }
 0x2c7   : > { %v1148_v61 = vadd.f32 1e-05, %v1132_v48  ;;  %v2550_v62 = vpop.eup %2549  ;;  %v1050_v1 = vmul.f32 %v3623_v0, %v2548_v60  ;;  %v981_v6 = vpop.xlane.xlu1 %980  ;;  %v1215_v9 = vmul.f32 %v3612_v42, %v1195_v59 }
 0x2c8   : > { %v853_v8 = vpop.xlane.xlu0 %852  ;;  %2559 = vrsqrt.f32 %v1020_v20  ;;  %v1007_v10 = vmul.f32 0.125, %v981_v6  ;;  %v1178_v55 = vmul.f32 %v3635_v17, %v2550_v62 }
 0x2c9   : > { %v879_v11 = vmul.f32 0.0625, %v853_v8  ;;  %2561 = vrsqrt.f32 %v1148_v61  ;;  %v1066_v14 = vadd.f32 %v1050_v1, %v922_v28  ;;  %v1231_v19 = vmul.f32 %v1215_v9, %v3437_v44 }
 0x2ca   : > { %v2552_v21 = vpop.eup %2551  ;;  %v1023_v16 = vadd.f32 1e-05, %v1007_v10 }
 0x2cb   : > { %v895_v22 = vadd.f32 1e-05, %v879_v11  ;;  %v2554_v24 = vpop.eup %2553  ;;  %v1053_v27 = vmul.f32 %v3623_v0, %v2552_v21  ;;  %v1109_v29 = vpop.xlane.xlu1 %1108  ;;  %v1194_v30 = vadd.f32 %v1178_v55, %v1066_v14  ;;  %v3641_v32 = vadd.f32 %v3630_v12, %v1231_v19 }
 0x2cc   : > { %v851_v31 = vpop.xlane.xlu0 %850  ;;  %v925_v34 = vmul.f32 %v3617_v53, %v2554_v24  ;;  %2563 = vrsqrt.f32 %v1023_v16  ;;  %v1135_v35 = vmul.f32 0.125, %v1109_v29 }
 0x2cd   : > { %v878_v37 = vmul.f32 0.0625, %v851_v31  ;;  %2565 = vrsqrt.f32 %v895_v22  ;;  %v1214_v44 = vmul.f32 %v3612_v42, %v1194_v30  ;;  %v1283_v15 = vmul.f32 0.70710677, %v3641_v32 }
 0x2ce   : > { %v2556_v38 = vpop.eup %2555  ;;  %v1151_v41 = vadd.f32 1e-05, %v1135_v35  ;;  %v1069_v40 = vadd.f32 %v1053_v27, %v925_v34 }
 0x2cf   : > { %v894_v63 = vadd.f32 1e-05, %v878_v37  ;;  %v1181_v49 = vmul.f32 %v3635_v17, %v2556_v38  ;;  %v979_v51 = vpop.xlane.xlu1 %978  ;;  %v1230_v54 = vmul.f32 %v1214_v44, %v3441_v47  ;;  %v2558_v56 = vpop.eup %2557 }
 0x2d0   : > { %v1107_v7 = vpop.xlane.xlu0 %1106  ;;  %2567 = vrsqrt.f32 %v1151_v41  ;;  %v1006_v57 = vmul.f32 0.125, %v979_v51  ;;  %v924_v20 = vmul.f32 %v3617_v53, %v2558_v56 }
 0x2d1   : > { %v1134_v18 = vmul.f32 0.125, %v1107_v7  ;;  %v1250_v58 = vadd.f32 %v3630_v12, %v1230_v54  ;;  %2569 = verf.f32 %v1283_v15  ;;  %v1197_v36 = vadd.f32 %v1181_v49, %v1069_v40 }
 0x2d2   : > { %v2560_v45 = vpop.eup %2559  ;;  %2571 = vrsqrt.f32 %v894_v63  ;;  %v1022_v48 = vadd.f32 1e-05, %v1006_v57  ;;  %v1267_v57 = vmul.f32 0.5, %v3641_v32 }
 0x2d3   : > { %v1150_v59 = vadd.f32 1e-05, %v1134_v18  ;;  %v2562_v60 = vpop.eup %2561  ;;  %v1052_v61 = vmul.f32 %v3623_v0, %v2560_v45  ;;  %v985_v62 = vpop.xlane.xlu1 %984  ;;  %v1282_v47 = vmul.f32 0.70710677, %v1250_v58  ;;  %v1217_v1 = vmul.f32 %v3612_v42, %v1197_v36 }
 0x2d4   : > { %v857_v28 = vpop.xlane.xlu0 %856  ;;  %2573 = vrsqrt.f32 %v1022_v48  ;;  %v1009_v6 = vmul.f32 0.125, %v985_v62  ;;  %v1180_v10 = vmul.f32 %v3635_v17, %v2562_v60  ;;  %v1266_v18 = vmul.f32 0.5, %v1250_v58 }
 0x2d5   : > { %v881_v8 = vmul.f32 0.0625, %v857_v28  ;;  %v1068_v9 = vadd.f32 %v1052_v61, %v924_v20  ;;  %2575 = vrsqrt.f32 %v1150_v59  ;;  %v1233_v11 = vmul.f32 %v1217_v1, %v3453_v2 }
 0x2d6   : > { %v2564_v14 = vpop.eup %2563  ;;  %v1025_v55 = vadd.f32 1e-05, %v1009_v6  ;;  %2577 = verf.f32 %v1282_v47 }
 0x2d7   : > { %v897_v19 = vadd.f32 1e-05, %v881_v8  ;;  %v2566_v21 = vpop.eup %2565  ;;  %v1055_v16 = vmul.f32 %v3623_v0, %v2564_v14  ;;  %v1113_v22 = vpop.xlane.xlu1 %1112  ;;  %v1196_v27 = vadd.f32 %v1180_v10, %v1068_v9  ;;  %v3656_v29 = vadd.f32 %v3630_v12, %v1233_v11 }
 0x2d8   : > { %v855_v24 = vpop.xlane.xlu0 %854  ;;  %v927_v31 = vmul.f32 %v3617_v53, %v2566_v21  ;;  %2579 = vrsqrt.f32 %v1025_v55  ;;  %v1137_v30 = vmul.f32 0.125, %v1113_v22 }
 0x2d9   : > { %v880_v34 = vmul.f32 0.0625, %v855_v24  ;;  %2581 = vrsqrt.f32 %v897_v19  ;;  %v1216_v2 = vmul.f32 %v3612_v42, %v1196_v27  ;;  %v1285_v35 = vmul.f32 0.70710677, %v3656_v29 }
 0x2da   : > { %v2568_v37 = vpop.eup %2567  ;;  %v1153_v44 = vadd.f32 1e-05, %v1137_v30  ;;  %v1071_v41 = vadd.f32 %v1055_v16, %v927_v31 }
 0x2db   : > { %v896_v15 = vadd.f32 1e-05, %v880_v34  ;;  %v2570_v38 = vpop.eup %2569  ;;  %v1183_v63 = vmul.f32 %v3635_v17, %v2568_v37  ;;  %v983_v40 = vpop.xlane.xlu1 %982  ;;  %v1232_v51 = vmul.f32 %v1216_v2, %v3466_v26 }
 0x2dc   : > { %v1111_v49 = vpop.xlane.xlu0 %1110  ;;  %v2572_v7 = vpop.eup %2571  ;;  %2583 = vrsqrt.f32 %v1153_v44  ;;  %v1008_v54 = vmul.f32 0.125, %v983_v40  ;;  %v1315_v20 = vadd.f32 1.0, %v2570_v38 }
 0x2dd   : > { %v1136_v56 = vmul.f32 0.125, %v1111_v49  ;;  %v1252_v36 = vadd.f32 %v3630_v12, %v1232_v51  ;;  %2585 = verf.f32 %v1285_v35  ;;  %v1199_v45 = vadd.f32 %v1183_v63, %v1071_v41 }
 0x2de   : > { %v2574_v48 = vpop.eup %2573  ;;  %2587 = vrsqrt.f32 %v896_v15  ;;  %v1024_v59 = vadd.f32 1e-05, %v1008_v54  ;;  %v926_v62 = vmul.f32 %v3617_v53, %v2572_v7  ;;  %v1331_v16 = vmul.f32 %v1315_v20, %v1267_v57 }
 0x2df   : > { %v1152_v60 = vadd.f32 1e-05, %v1136_v56  ;;  %v2576_v61 = vpop.eup %2575  ;;  %v1054_v26 = vmul.f32 %v3623_v0, %v2574_v48  ;;  %v989_v28 = vpop.xlane.xlu1 %988  ;;  %v1284_v1 = vmul.f32 0.70710677, %v1252_v36  ;;  %v1219_v32 = vmul.f32 %v3612_v42, %v1199_v45 }
 0x2e0   : > { %v861_v47 = vpop.xlane.xlu0 %860  ;;  %v2578_v58 = vpop.eup %2577  ;;  %v1182_v6 = vmul.f32 %v3635_v17, %v2576_v61  ;;  %2589 = vrsqrt.f32 %v1024_v59  ;;  %v1011_v8 = vmul.f32 0.125, %v989_v28  ;;  %v1269_v48 = vmul.f32 0.5, %v3656_v29 }
 0x2e1   : > { %v883_v9 = vmul.f32 0.0625, %v861_v47  ;;  %v1070_v10 = vadd.f32 %v1054_v26, %v926_v62  ;;  %2591 = vrsqrt.f32 %v1152_v60  ;;  %v1314_v11 = vadd.f32 1.0, %v2578_v58 }
 0x2e2   : > { %v1235_v14 = vmul.f32 %v1219_v32, %v3475_v50  ;;  %v2580_v55 = vpop.eup %2579  ;;  %v1027_v19 = vadd.f32 1e-05, %v1011_v8  ;;  %2593 = verf.f32 %v1284_v1  ;;  %v1268_v59 = vmul.f32 0.5, %v1252_v36 }
 0x2e3   : > { %v899_v21 = vadd.f32 1e-05, %v883_v9  ;;  %v2582_v22 = vpop.eup %2581  ;;  %v1057_v24 = vmul.f32 %v3623_v0, %v2580_v55  ;;  %v1117_v27 = vpop.xlane.xlu1 %1116  ;;  %v1330_v30 = vmul.f32 %v1314_v11, %v1266_v18  ;;  %v1198_v34 = vadd.f32 %v1182_v6, %v1070_v10 }
 0x2e4   : > { %v859_v31 = vpop.xlane.xlu0 %858  ;;  %v3672_v2 = vadd.f32 %v3630_v12, %v1235_v14  ;;  %v929_v35 = vmul.f32 %v3617_v53, %v2582_v22  ;;  %2595 = vrsqrt.f32 %v1027_v19  ;;  %v1139_v37 = vmul.f32 0.125, %v1117_v27 }
 0x2e5   : > { %v882_v50 = vmul.f32 0.0625, %v859_v31  ;;  %2597 = vrsqrt.f32 %v899_v21  ;;  %2367 = vmatprep.mubr.f32.mxu1 %v1330_v30  ;;  %v1218_v44 = vmul.f32 %v3612_v42, %v1198_v34 }
 0x2e6   : > { %v1287_v15 = vmul.f32 0.70710677, %v3672_v2  ;;  %v2584_v38 = vpop.eup %2583  ;;  %v1155_v41 = vadd.f32 1e-05, %v1139_v37  ;;  %2368 = vmatmul.mubr.f32.vlgmr.msra.gmra.mrb[0].mxu1 %v1331_v16  ;;  %v1073_v49 = vadd.f32 %v1057_v24, %v929_v35 }
 0x2e7   : > { %v898_v63 = vadd.f32 1e-05, %v882_v50  ;;  %v2586_v40 = vpop.eup %2585  ;;  %v1185_v51 = vmul.f32 %v3635_v17, %v2584_v38  ;;  %v987_v7 = vpop.xlane.xlu1 %986  ;;  %v1234_v56 = vmul.f32 %v1218_v44, %v3488_v4 }
 0x2e8   : > { %v1115_v54 = vpop.xlane.xlu0 %1114  ;;  %v2588_v57 = vpop.eup %2587  ;;  %2599 = vrsqrt.f32 %v1155_v41  ;;  %v1010_v18 = vmul.f32 0.125, %v987_v7  ;;  %v1317_v28 = vadd.f32 1.0, %v2586_v40 }
 0x2e9   : > { %v1138_v45 = vmul.f32 0.125, %v1115_v54  ;;  %v1254_v60 = vadd.f32 %v3630_v12, %v1234_v56  ;;  %2601 = verf.f32 %v1287_v15  ;;  %v1201_v20 = vadd.f32 %v1185_v51, %v1073_v49 }
 0x2ea   : > { %v2590_v61 = vpop.eup %2589  ;;  %2603 = vrsqrt.f32 %v898_v63  ;;  %v1026_v62 = vadd.f32 1e-05, %v1010_v18  ;;  %v928_v1 = vmul.f32 %v3617_v53, %v2588_v57  ;;  %v1333_v22 = vmul.f32 %v1317_v28, %v1269_v48 }
 0x2eb   : > { %v1154_v26 = vadd.f32 1e-05, %v1138_v45  ;;  %v2592_v47 = vpop.eup %2591  ;;  %v1056_v4 = vmul.f32 %v3623_v0, %v2590_v61  ;;  %v993_v32 = vpop.xlane.xlu1 %992  ;;  %v1286_v6 = vmul.f32 0.70710677, %v1254_v60  ;;  %v1221_v29 = vmul.f32 %v3612_v42, %v1201_v20 }
 0x2ec   : > { %v865_v58 = vpop.xlane.xlu0 %864  ;;  %v2594_v36 = vpop.eup %2593  ;;  %v1184_v8 = vmul.f32 %v3635_v17, %v2592_v47  ;;  %2605 = vrsqrt.f32 %v1026_v62  ;;  %v1013_v9 = vmul.f32 0.125, %v993_v32  ;;  %v1270_v20 = vmul.f32 0.5, %v1254_v60 }
 0x2ed   : > { %v885_v10 = vmul.f32 0.0625, %v865_v58  ;;  %v1072_v11 = vadd.f32 %v1056_v4, %v928_v1  ;;  %2607 = vrsqrt.f32 %v1154_v26  ;;  %v1316_v14 = vadd.f32 1.0, %v2594_v36 }
 0x2ee   : > { %v1237_v55 = vmul.f32 %v1221_v29, %v3497_v25  ;;  %v2596_v19 = vpop.eup %2595  ;;  %v1029_v21 = vadd.f32 1e-05, %v1013_v9  ;;  %2609 = verf.f32 %v1286_v6 }
 0x2ef   : > { %v901_v16 = vadd.f32 1e-05, %v885_v10  ;;  %v2598_v24 = vpop.eup %2597  ;;  %v1059_v27 = vmul.f32 %v3623_v0, %v2596_v19  ;;  %v1121_v31 = vpop.xlane.xlu1 %1120  ;;  %v1332_v34 = vmul.f32 %v1316_v14, %v1268_v59  ;;  %v1200_v35 = vadd.f32 %v1184_v8, %v1072_v11 }
 0x2f0   : > { %v863_v30 = vpop.xlane.xlu0 %862  ;;  %v3688_v37 = vadd.f32 %v3630_v12, %v1237_v55  ;;  %v931_v50 = vmul.f32 %v3617_v53, %v2598_v24  ;;  %2611 = vrsqrt.f32 %v1029_v21  ;;  %v1141_v44 = vmul.f32 0.125, %v1121_v31 }
 0x2f1   : > { %v884_v25 = vmul.f32 0.0625, %v863_v30  ;;  %2613 = vrsqrt.f32 %v901_v16  ;;  %2370 = vmatprep.mubr.f32.mxu1 %v1332_v34  ;;  %v1220_v15 = vmul.f32 %v3612_v42, %v1200_v35  ;;  %v1271_v59 = vmul.f32 0.5, %v3672_v2 }
 0x2f2   : > { %v1289_v38 = vmul.f32 0.70710677, %v3688_v37  ;;  %v2600_v41 = vpop.eup %2599  ;;  %v1157_v63 = vadd.f32 1e-05, %v1141_v44  ;;  %2371 = vmatmul.mubr.f32.gmra.mrb[2].mxu1 %v1333_v22  ;;  %v1075_v51 = vadd.f32 %v1059_v27, %v931_v50 }
 0x2f3   : > { %v900_v40 = vadd.f32 1e-05, %v884_v25  ;;  %v2602_v49 = vpop.eup %2601  ;;  %v1187_v7 = vmul.f32 %v3635_v17, %v2600_v41  ;;  %v991_v54 = vpop.xlane.xlu1 %990  ;;  %v1236_v57 = vmul.f32 %v1220_v15, %v3510_v52 }
 0x2f4   : > { %v1119_v56 = vpop.xlane.xlu0 %1118  ;;  %v2604_v18 = vpop.eup %2603  ;;  %2615 = vrsqrt.f32 %v1157_v63  ;;  %v1012_v45 = vmul.f32 0.125, %v991_v54  ;;  %v1319_v1 = vadd.f32 1.0, %v2602_v49 }
 0x2f5   : > { %v1140_v48 = vmul.f32 0.125, %v1119_v56  ;;  %v1256_v61 = vadd.f32 %v3630_v12, %v1236_v57  ;;  %2617 = verf.f32 %v1289_v38  ;;  %v1203_v62 = vadd.f32 %v1187_v7, %v1075_v51 }
 0x2f6   : > { %v2606_v26 = vpop.eup %2605  ;;  %2619 = vrsqrt.f32 %v900_v40  ;;  %v1028_v28 = vadd.f32 1e-05, %v1012_v45  ;;  %v930_v32 = vmul.f32 %v3617_v53, %v2604_v18  ;;  %v1335_v16 = vmul.f32 %v1319_v1, %v1271_v59 }
 0x2f7   : > { %v1156_v47 = vadd.f32 1e-05, %v1140_v48  ;;  %v2608_v4 = vpop.eup %2607  ;;  %v1058_v52 = vmul.f32 %v3623_v0, %v2606_v26  ;;  %v997_v58 = vpop.xlane.xlu1 %996  ;;  %v1288_v29 = vmul.f32 0.70710677, %v1256_v61  ;;  %v1223_v2 = vmul.f32 %v3612_v42, %v1203_v62 }
 0x2f8   : > { %v869_v6 = vpop.xlane.xlu0 %868  ;;  %v2610_v60 = vpop.eup %2609  ;;  %v1186_v36 = vmul.f32 %v3635_v17, %v2608_v4  ;;  %2621 = vrsqrt.f32 %v1028_v28  ;;  %v1015_v8 = vmul.f32 0.125, %v997_v58  ;;  %v1272_v48 = vmul.f32 0.5, %v1256_v61 }
 0x2f9   : > { %v887_v9 = vmul.f32 0.0625, %v869_v6  ;;  %v1074_v10 = vadd.f32 %v1058_v52, %v930_v32  ;;  %2623 = vrsqrt.f32 %v1156_v47  ;;  %v1318_v11 = vadd.f32 1.0, %v2610_v60 }
 0x2fa   : > { %v1239_v14 = vmul.f32 %v1223_v2, %v3520_v13  ;;  %v2612_v55 = vpop.eup %2611  ;;  %v1031_v19 = vadd.f32 1e-05, %v1015_v8  ;;  %2625 = verf.f32 %v1288_v29 }
 0x2fb   : > { %v903_v21 = vadd.f32 1e-05, %v887_v9  ;;  %v2614_v22 = vpop.eup %2613  ;;  %v1061_v24 = vmul.f32 %v3623_v0, %v2612_v55  ;;  %v1125_v27 = vpop.xlane.xlu1 %1124  ;;  %v1334_v30 = vmul.f32 %v1318_v11, %v1270_v20  ;;  %v1202_v34 = vadd.f32 %v1186_v36, %v1074_v10 }
 0x2fc   : > { %v867_v31 = vpop.xlane.xlu0 %866  ;;  %v3704_v35 = vadd.f32 %v3630_v12, %v1239_v14  ;;  %v933_v50 = vmul.f32 %v3617_v53, %v2614_v22  ;;  %2627 = vrsqrt.f32 %v1031_v19  ;;  %v1143_v44 = vmul.f32 0.125, %v1125_v27 }
 0x2fd   : > { %v886_v13 = vmul.f32 0.0625, %v867_v31  ;;  %2629 = vrsqrt.f32 %v903_v21  ;;  %2373 = vmatprep.mubr.f32.mxu1 %v1334_v30  ;;  %v1222_v25 = vmul.f32 %v3612_v42, %v1202_v34  ;;  %v1273_v55 = vmul.f32 0.5, %v3688_v37 }
 0x2fe   : > { %v1291_v15 = vmul.f32 0.70710677, %v3704_v35  ;;  %v2616_v38 = vpop.eup %2615  ;;  %v1159_v41 = vadd.f32 1e-05, %v1143_v44  ;;  %2374 = vmatmul.mubr.f32.gmra.mrb[4].mxu1 %v1335_v16  ;;  %v1077_v49 = vadd.f32 %v1061_v24, %v933_v50 }
 0x2ff   : > { %v902_v63 = vadd.f32 1e-05, %v886_v13  ;;  %v2618_v40 = vpop.eup %2617  ;;  %v1189_v51 = vmul.f32 %v3635_v17, %v2616_v38  ;;  %v995_v7 = vpop.xlane.xlu1 %994  ;;  %v1238_v56 = vmul.f32 %v1222_v25, %v3532_v23 }
 0x300   : > { %v1123_v54 = vpop.xlane.xlu0 %1122  ;;  %v2620_v57 = vpop.eup %2619  ;;  %2631 = vrsqrt.f32 %v1159_v41  ;;  %v1014_v18 = vmul.f32 0.125, %v995_v7  ;;  %v1321_v47 = vadd.f32 1.0, %v2618_v40 }
 0x301   : > { %v1142_v45 = vmul.f32 0.125, %v1123_v54  ;;  %v3712_v59 = vadd.f32 %v3630_v12, %v1238_v56  ;;  %2633 = verf.f32 %v1291_v15  ;;  %v1205_v20 = vadd.f32 %v1189_v51, %v1077_v49 }
 0x302   : > { %v2622_v62 = vpop.eup %2621  ;;  %2635 = vrsqrt.f32 %v902_v63  ;;  %v1030_v26 = vadd.f32 1e-05, %v1014_v18  ;;  %v932_v4 = vmul.f32 %v3617_v53, %v2620_v57  ;;  %v1337_v50 = vmul.f32 %v1321_v47, %v1273_v55 }
 0x303   : > { %v1158_v28 = vadd.f32 1e-05, %v1142_v45  ;;  %v2624_v1 = vpop.eup %2623  ;;  %v1060_v23 = vmul.f32 %v3623_v0, %v2622_v62  ;;  %v1001_v32 = vpop.xlane.xlu1 %1000  ;;  %v1290_v58 = vmul.f32 0.70710677, %v3712_v59  ;;  %v1225_v61 = vmul.f32 %v3612_v42, %v1205_v20 }
 0x304   : > { %v873_v52 = vpop.xlane.xlu0 %872  ;;  %v2626_v6 = vpop.eup %2625  ;;  %v1188_v29 = vmul.f32 %v3635_v17, %v2624_v1  ;;  %2637 = vrsqrt.f32 %v1030_v26  ;;  %v1017_v2 = vmul.f32 0.125, %v1001_v32 }
 0x305   : > { %v889_v60 = vmul.f32 0.0625, %v873_v52  ;;  %v1076_v36 = vadd.f32 %v1060_v23, %v932_v4  ;;  %2639 = vrsqrt.f32 %v1158_v28  ;;  %v1320_v8 = vadd.f32 1.0, %v2626_v6 }
 0x306   : > { %v1241_v9 = vmul.f32 %v1225_v61, %v3542_v3  ;;  %v2628_v10 = vpop.eup %2627  ;;  %v1033_v11 = vadd.f32 1e-05, %v1017_v2  ;;  %2641 = verf.f32 %v1290_v58  ;;  %v1274_v23 = vmul.f32 0.5, %v3712_v59 }
 0x307   : > { %v905_v14 = vadd.f32 1e-05, %v889_v60  ;;  %v2630_v19 = vpop.eup %2629  ;;  %v1063_v21 = vmul.f32 %v3623_v0, %v2628_v10  ;;  %v999_v16 = vpop.xlane.xlu1 %998  ;;  %v1336_v24 = vmul.f32 %v1320_v8, %v1272_v48  ;;  %v1204_v27 = vadd.f32 %v1188_v29, %v1076_v36 }
 0x308   : > { %v871_v22 = vpop.xlane.xlu0 %870  ;;  %v3723_v31 = vadd.f32 %v3630_v12, %v1241_v9  ;;  %v935_v30 = vmul.f32 %v3617_v53, %v2630_v19  ;;  %v1016_v34 = vmul.f32 0.125, %v999_v16  ;;  %2643 = vrsqrt.f32 %v1033_v11 }
 0x309   : > { %v888_v3 = vmul.f32 0.0625, %v871_v22  ;;  %2376 = vmatprep.mubr.f32.mxu1 %v1336_v24  ;;  %v1224_v37 = vmul.f32 %v3612_v42, %v1204_v27  ;;  %2645 = vrsqrt.f32 %v905_v14  ;;  %v1275_v6 = vmul.f32 0.5, %v3704_v35 }
 0x30a   : > { %v2632_v44 = vpop.eup %2631  ;;  %v1032_v13 = vadd.f32 1e-05, %v1016_v34  ;;  %2377 = vmatmul.mubr.f32.gmra.mrb[6].mxu1 %v1337_v50  ;;  %v1293_v15 = vmul.f32 0.70710677, %v3723_v31  ;;  %v1079_v41 = vadd.f32 %v1063_v21, %v935_v30 }
 0x30b   : > { %v904_v25 = vadd.f32 1e-05, %v888_v3  ;;  %v2634_v38 = vpop.eup %2633  ;;  %v1191_v63 = vmul.f32 %v3635_v17, %v2632_v44  ;;  %v1129_v40 = vpop.xlane.xlu1 %1128  ;;  %v1240_v51 = vmul.f32 %v1224_v37, %v3554_v33 }
 0x30c   : > { %v1127_v49 = vpop.xlane.xlu0 %1126  ;;  %v2636_v7 = vpop.eup %2635  ;;  %2647 = vrsqrt.f32 %v1032_v13  ;;  %v1145_v54 = vmul.f32 0.125, %v1129_v40  ;;  %v1323_v32 = vadd.f32 1.0, %v2634_v38 }
 0x30d   : > { %v1144_v56 = vmul.f32 0.125, %v1127_v49  ;;  %2649 = vrsqrt.f32 %v904_v25  ;;  %v1260_v57 = vadd.f32 %v3630_v12, %v1240_v51  ;;  %v1207_v18 = vadd.f32 %v1191_v63, %v1079_v41 }
 0x30e   : > { %v2638_v45 = vpop.eup %2637  ;;  %v1161_v48 = vadd.f32 1e-05, %v1145_v54  ;;  %2651 = verf.f32 %v1293_v15  ;;  %v934_v26 = vmul.f32 %v3617_v53, %v2636_v7  ;;  %v1339_v9 = vmul.f32 %v1323_v32, %v1275_v6  ;;  %v3755_v32 = vld [vmem:[#allocation8 + $0x3] ss:$0 sm:$0xff] }
 0x30f   : > { %v1160_v20 = vadd.f32 1e-05, %v1144_v56  ;;  %v2640_v62 = vpop.eup %2639  ;;  %v1062_v28 = vmul.f32 %v3623_v0, %v2638_v45  ;;  %v1292_v47 = vmul.f32 0.70710677, %v1260_v57  ;;  %v1227_v33 = vmul.f32 %v3612_v42, %v1207_v18 }
 0x310   : > { %v2642_v1 = vpop.eup %2641  ;;  %v1190_v4 = vmul.f32 %v3635_v17, %v2640_v62  ;;  %2653 = vrsqrt.f32 %v1161_v48 }
 0x311   : > { %v1078_v52 = vadd.f32 %v1062_v28, %v934_v26  ;;  %2655 = vrsqrt.f32 %v1160_v20  ;;  %v1322_v58 = vadd.f32 1.0, %v2642_v1  ;;  %v1243_v61 = vmul.f32 %v1227_v33, %v3564_v5 }
 0x312   : > { %2657 = verf.f32 %v1292_v47  ;;  %v2644_v29 = vpop.eup %2643 }
 0x313   : > { %v1338_v2 = vmul.f32 %v1322_v58, %v1274_v23  ;;  %v1206_v60 = vadd.f32 %v1190_v4, %v1078_v52  ;;  %v1263_v36 = vadd.f32 %v3630_v12, %v1243_v61  ;;  %v2646_v8 = vpop.eup %2645  ;;  %v1065_v55 = vmul.f32 %v3623_v0, %v2644_v29  ;;  %v2188_v4 = vld [vmem:[#allocation8] ss:$0 sm:$0xff] }
 0x314   : > { %v937_v5 = vmul.f32 %v3617_v53, %v2646_v8 }
 0x315   : > { %2379 = vmatprep.mubr.f32.mxu1 %v1338_v2  ;;  %v1226_v10 = vmul.f32 %v3612_v42, %v1206_v60  ;;  %v1295_v11 = vmul.f32 0.70710677, %v1263_v36 }
 0x316   : > { %v2648_v59 = vpop.eup %2647  ;;  %2380 = vmatmul.mubr.f32.gmra.mrb[8].mxu1 %v1339_v9  ;;  %v1081_v30 = vadd.f32 %v1065_v55, %v937_v5 }
 0x317   : > { %v2650_v14 = vpop.eup %2649  ;;  %v1242_v35 = vmul.f32 %v1226_v10, %v3576_v39  ;;  %v1064_v21 = vmul.f32 %v3623_v0, %v2648_v59  ;;  %2659 = verf.f32 %v1295_v11  ;;  %v1276_v39 = vmul.f32 0.5, %v1260_v57 }
 0x318   : > { %v2652_v19 = vpop.eup %2651  ;;  %v936_v16 = vmul.f32 %v3617_v53, %v2650_v14  ;;  %v1277_v53 = vmul.f32 0.5, %v3723_v31 }
 0x319   : > { %v1262_v22 = vadd.f32 %v3630_v12, %v1242_v35  ;;  %v1325_v13 = vadd.f32 1.0, %v2652_v19 }
 0x31a   : > { %v2654_v24 = vpop.eup %2653  ;;  %v1080_v37 = vadd.f32 %v1064_v21, %v936_v16 }
 0x31b   : > { %v2656_v27 = vpop.eup %2655  ;;  %v1193_v34 = vmul.f32 %v3635_v17, %v2654_v24  ;;  %v1294_v3 = vmul.f32 0.70710677, %v1262_v22  ;;  %v1341_v63 = vmul.f32 %v1325_v13, %v1277_v53  ;;  %v1278_v45 = vmul.f32 0.5, %v1262_v22 }
 0x31c   : > { %v2658_v50 = vpop.eup %2657  ;;  %v1192_v44 = vmul.f32 %v3635_v17, %v2656_v27 }
 0x31d   : > { %v1324_v25 = vadd.f32 1.0, %v2658_v50  ;;  %2661 = verf.f32 %v1294_v3  ;;  %v1209_v0 = vadd.f32 %v1193_v34, %v1081_v30 }
 0x31e   : > { %v1208_v15 = vadd.f32 %v1192_v44, %v1080_v37 }
 0x31f   : > { %v1340_v38 = vmul.f32 %v1324_v25, %v1276_v39  ;;  %v1229_v41 = vmul.f32 %v3612_v42, %v1209_v0 }
 0x320   : > { %v1228_v40 = vmul.f32 %v3612_v42, %v1208_v15  ;;  %v1279_v42 = vmul.f32 0.5, %v1263_v36 }
 0x321   : > { %2382 = vmatprep.mubr.f32.mxu1 %v1340_v38  ;;  %v1245_v49 = vmul.f32 %v1229_v41, %v3585_v46  ;;  %v2660_v7 = vpop.eup %2659 }
 0x322   : > { %2383 = vmatmul.mubr.f32.gmra.mrb[10].mxu1 %v1341_v63  ;;  %v1244_v17 = vmul.f32 %v1228_v40, %v3596_v43  ;;  %v1327_v18 = vadd.f32 1.0, %v2660_v7 }
 0x323   : > { %v1265_v51 = vadd.f32 %v3630_v12, %v1245_v49 }
 0x324   : > { %v1264_v54 = vadd.f32 %v3630_v12, %v1244_v17  ;;  %v1343_v62 = vmul.f32 %v1327_v18, %v1279_v42  ;;  %v2994_v18 = vmov 32  }
 0x325   : > { %v1297_v56 = vmul.f32 0.70710677, %v1265_v51  ;;  %v1281_v26 = vmul.f32 0.5, %v1265_v51  ;;  %2538 = vset.pattern.permute.xlu1 %v2994_v18  ;;  %2537 = vset.pattern.permute.xlu0 %v2994_v18 }
 0x326   : > { %v1296_v31 = vmul.f32 0.70710677, %v1264_v54  ;;  %v1280_v47 = vmul.f32 0.5, %v1264_v54 }
 0x327   : > { %v2662_v57 = vpop.eup %2661  ;;  %2663 = verf.f32 %v1297_v56 }
 0x328   : > { %v1326_v48 = vadd.f32 1.0, %v2662_v57  ;;  %2665 = verf.f32 %v1296_v31 }
 0x32a   : > { %v1342_v20 = vmul.f32 %v1326_v48, %v1278_v45 }
 0x32c   : > { %2385 = vmatprep.mubr.f32.mxu1 %v1342_v20 }
 0x32d   : > { %2386 = vmatmul.mubr.f32.gmra.mrb[12].mxu1 %v1343_v62 }
 0x331   : > { %v2664_v46 = vpop.eup %2663 }
 0x332   : > { %v2666_v43 = vpop.eup %2665  ;;  %v1329_v28 = vadd.f32 1.0, %v2664_v46 }
 0x333   : > { %v1328_v33 = vadd.f32 1.0, %v2666_v43 }
 0x334   : > { %v1345_v12 = vmul.f32 %v1329_v28, %v1281_v26 }
 0x335   : > { %v1344_v1 = vmul.f32 %v1328_v33, %v1280_v47 }
 0x337   : > { %2388 = vmatprep.mubr.f32.mxu1 %v1344_v1 }
 0x338   : > { %2389 = vmatmul.mubr.f32.gmra.mrb[14].mxu1 %v1345_v12 }
 0x3b9   : > { %v2369_v23 = vpop.f32.mrb[0].mxu1 }
 0x3ba   : > { %v3757_v52 = vadd.f32 %v2369_v23, %v2188_v4  ;;  %v1416_v58 = vpop.f32.mrb[1].mxu1 }
 0x3bb   : > { %v3759_v61 = vadd.f32 %v2188_v4, %v1416_v58 }
 0x3bc   : > { %v1596_v6 = vmul.f32 %v3755_v32, %v3757_v52 }
 0x3bd   : > { %v1595_v29 = vmul.f32 %v3755_v32, %v3759_v61 }
 0x3be   : > { %1613 = vadd.xlane.f32.xlu1 %v1596_v6 }
 0x3bf   : > { %1611 = vadd.xlane.f32.xlu0 %v1595_v29 }
 0x3c5   : > { %v2372_v2 = vpop.f32.mrb[2].mxu1 }
 0x3c6   : > { %v3765_v60 = vadd.f32 %v2372_v2, %v2188_v4  ;;  %v1426_v36 = vpop.f32.mrb[3].mxu1 }
 0x3c7   : > { %v3767_v8 = vadd.f32 %v2188_v4, %v1426_v36 }
 0x3c8   : > { %v1598_v9 = vmul.f32 %v3755_v32, %v3765_v60 }
 0x3c9   : > { %v1597_v10 = vmul.f32 %v3755_v32, %v3767_v8 }
 0x3ca   : > { %1617 = vadd.xlane.f32.xlu1 %v1598_v9 }
 0x3cb   : > { %1615 = vadd.xlane.f32.xlu0 %v1597_v10 }
 0x3d1   : > { %v2375_v59 = vpop.f32.mrb[4].mxu1 }
 0x3d2   : > { %v3773_v11 = vadd.f32 %v2375_v59, %v2188_v4  ;;  %v1436_v14 = vpop.f32.mrb[5].mxu1 }
 0x3d3   : > { %v3775_v55 = vadd.f32 %v2188_v4, %v1436_v14 }
 0x3d4   : > { %v1600_v5 = vmul.f32 %v3755_v32, %v3773_v11 }
 0x3d5   : > { %v1599_v35 = vmul.f32 %v3755_v32, %v3775_v55 }
 0x3d6   : > { %1621 = vadd.xlane.f32.xlu1 %v1600_v5 }
 0x3d7   : > { %1619 = vadd.xlane.f32.xlu0 %v1599_v35 }
 0x3dd   : > { %v2378_v19 = vpop.f32.mrb[6].mxu1 }
 0x3de   : > { %v3781_v21 = vadd.f32 %v2378_v19, %v2188_v4  ;;  %v1446_v16 = vpop.f32.mrb[7].mxu1 }
 0x3df   : > { %v3783_v22 = vadd.f32 %v2188_v4, %v1446_v16 }
 0x3e0   : > { %v1602_v24 = vmul.f32 %v3755_v32, %v3781_v21 }
 0x3e1   : > { %v1601_v27 = vmul.f32 %v3755_v32, %v3783_v22 }
 0x3e2   : > { %1625 = vadd.xlane.f32.xlu1 %v1602_v24 }
 0x3e3   : > { %1623 = vadd.xlane.f32.xlu0 %v1601_v27 }
 0x3e9   : > { %v2381_v30 = vpop.f32.mrb[8].mxu1 }
 0x3ea   : > { %v3789_v34 = vadd.f32 %v2381_v30, %v2188_v4  ;;  %v1456_v3 = vpop.f32.mrb[9].mxu1 }
 0x3eb   : > { %v3791_v50 = vadd.f32 %v2188_v4, %v1456_v3 }
 0x3ec   : > { %v1604_v37 = vmul.f32 %v3755_v32, %v3789_v34 }
 0x3ed   : > { %v1603_v44 = vmul.f32 %v3755_v32, %v3791_v50 }
 0x3ee   : > { %1629 = vadd.xlane.f32.xlu1 %v1604_v37 }
 0x3ef   : > { %1627 = vadd.xlane.f32.xlu0 %v1603_v44 }
 0x3f5   : > { %v2384_v13 = vpop.f32.mrb[10].mxu1 }
 0x3f6   : > { %v3797_v39 = vadd.f32 %v2384_v13, %v2188_v4  ;;  %v1466_v25 = vpop.f32.mrb[11].mxu1 }
 0x3f7   : > { %v3799_v0 = vadd.f32 %v2188_v4, %v1466_v25 }
 0x3f8   : > { %v1606_v53 = vmul.f32 %v3755_v32, %v3797_v39 }
 0x3f9   : > { %v1605_v15 = vmul.f32 %v3755_v32, %v3799_v0 }
 0x3fa   : > { %1633 = vadd.xlane.f32.xlu1 %v1606_v53 }
 0x3fb   : > { %1631 = vadd.xlane.f32.xlu0 %v1605_v15 }
 0x400   : > { %v2387_v38 = vpop.f32.mrb[12].mxu1 }
 0x401   : > { %v3805_v41 = vadd.f32 %v2387_v38, %v2188_v4  ;;  %v1476_v63 = vpop.f32.mrb[13].mxu1 }
 0x402   : > { %v3807_v40 = vadd.f32 %v2188_v4, %v1476_v63 }
 0x403   : > { %v1608_v49 = vmul.f32 %v3755_v32, %v3805_v41 }
 0x404   : > { %v1607_v17 = vmul.f32 %v3755_v32, %v3807_v40 }
 0x405   : > { %1637 = vadd.xlane.f32.xlu1 %v1608_v49 }
 0x406   : > { %1635 = vadd.xlane.f32.xlu0 %v1607_v17 }
 0x40b   : > { %v2390_v51 = vpop.f32.mrb[14].mxu1 }
 0x40c   : > { %v3813_v7 = vadd.f32 %v2390_v51, %v2188_v4  ;;  %v1486_v54 = vpop.f32.mrb[15].mxu1 }
 0x40d   : > { %v3815_v56 = vadd.f32 %v2188_v4, %v1486_v54 }
 0x40e   : > { %v1610_v31 = vmul.f32 %v3755_v32, %v3813_v7 }
 0x40f   : > { %v1609_v57 = vmul.f32 %v3755_v32, %v3815_v56 }
 0x410   : > { %1641 = vadd.xlane.f32.xlu1 %v1610_v31 }
 0x411   : > { %1639 = vadd.xlane.f32.xlu0 %v1609_v57 }
 0x44b   : > { %v1614_v45 = vpop.xlane.xlu1 %1613 }
 0x44c   : > { %v1644_v48 = vmul.f32 0.03125, %v1614_v45  ;;  %v1612_v42 = vpop.xlane.xlu0 %1611 }
 0x44d   : > { %v1643_v20 = vmul.f32 0.03125, %v1612_v42 }
 0x44e   : > { %v3822_v62 = vsub.f32 %v3757_v52, %v1644_v48 }
 0x44f   : > { %v3825_v46 = vsub.f32 %v3759_v61, %v1643_v20 }
 0x450   : > { %v1676_v43 = vmul.f32 %v3755_v32, %v3822_v62 }
 0x451   : > { %v1675_v26 = vmul.f32 %v3755_v32, %v3825_v46 }
 0x452   : > { %v1692_v28 = vmul.f32 %v1676_v43, %v1676_v43 }
 0x453   : > { %v1691_v47 = vmul.f32 %v1675_v26, %v1675_v26 }
 0x454   : > { %1709 = vadd.xlane.f32.xlu1 %v1692_v28 }
 0x455   : > { %1707 = vadd.xlane.f32.xlu0 %v1691_v47 }
 0x457   : > { %v1618_v33 = vpop.xlane.xlu1 %1617 }
 0x458   : > { %v1646_v12 = vmul.f32 0.03125, %v1618_v33  ;;  %v1616_v1 = vpop.xlane.xlu0 %1615 }
 0x459   : > { %v1645_v4 = vmul.f32 0.03125, %v1616_v1 }
 0x45a   : > { %v3832_v23 = vsub.f32 %v3765_v60, %v1646_v12 }
 0x45b   : > { %v3835_v58 = vsub.f32 %v3767_v8, %v1645_v4 }
 0x45c   : > { %v1678_v6 = vmul.f32 %v3755_v32, %v3832_v23 }
 0x45d   : > { %v1677_v29 = vmul.f32 %v3755_v32, %v3835_v58 }
 0x45e   : > { %v1694_v2 = vmul.f32 %v1678_v6, %v1678_v6 }
 0x45f   : > { %v1693_v36 = vmul.f32 %v1677_v29, %v1677_v29 }
 0x460   : > { %1713 = vadd.xlane.f32.xlu1 %v1694_v2  ;;  %v2190_v2 = vmul.f32 -1.442695, %v3757_v52  ;;  %v2189_v52 = vmul.f32 -1.442695, %v3759_v61 }
 0x461   : > { %1711 = vadd.xlane.f32.xlu0 %v1693_v36 }
 0x462   : > { %2667 = vpow2.f32 %v2190_v2 }
 0x463   : > { %v1622_v9 = vpop.xlane.xlu1 %1621 }
 0x464   : > { %v1648_v10 = vmul.f32 0.03125, %v1622_v9  ;;  %v1620_v59 = vpop.xlane.xlu0 %1619 }
 0x465   : > { %v1647_v14 = vmul.f32 0.03125, %v1620_v59 }
 0x466   : > { %v3842_v5 = vsub.f32 %v3773_v11, %v1648_v10 }
 0x467   : > { %v3845_v35 = vsub.f32 %v3775_v55, %v1647_v14 }
 0x468   : > { %v1680_v19 = vmul.f32 %v3755_v32, %v3842_v5 }
 0x469   : > { %v1679_v16 = vmul.f32 %v3755_v32, %v3845_v35 }
 0x46a   : > { %v1696_v24 = vmul.f32 %v1680_v19, %v1680_v19  ;;  %v2191_v19 = vmul.f32 -1.442695, %v3767_v8 }
 0x46b   : > { %v1695_v27 = vmul.f32 %v1679_v16, %v1679_v16 }
 0x46c   : > { %1717 = vadd.xlane.f32.xlu1 %v1696_v24  ;;  %2669 = vpow2.f32 %v2191_v19  ;;  %v2668_v61 = vpop.eup %2667 }
 0x46d   : > { %1715 = vadd.xlane.f32.xlu0 %v1695_v27  ;;  %2671 = vpow2.f32 %v2189_v52 }
 0x46f   : > { %v1626_v30 = vpop.xlane.xlu1 %1625 }
 0x470   : > { %v1650_v3 = vmul.f32 0.03125, %v1626_v30  ;;  %v1624_v37 = vpop.xlane.xlu0 %1623 }
 0x471   : > { %v1649_v44 = vmul.f32 0.03125, %v1624_v37  ;;  %v2198_v37 = vmul.f32 -1.442695, %v3789_v34 }
 0x472   : > { %v3852_v13 = vsub.f32 %v3781_v21, %v1650_v3  ;;  %v2192_v3 = vmul.f32 -1.442695, %v3765_v60  ;;  %v2200_v60 = vmul.f32 -1.442695, %v3797_v39 }
 0x473   : > { %v3855_v25 = vsub.f32 %v3783_v22, %v1649_v44 }
 0x474   : > { %v1682_v53 = vmul.f32 %v3755_v32, %v3852_v13  ;;  %2673 = vpow2.f32 %v2192_v3 }
 0x475   : > { %v1681_v15 = vmul.f32 %v3755_v32, %v3855_v25  ;;  %2675 = vpow2.f32 %v2198_v37 }
 0x476   : > { %v1698_v38 = vmul.f32 %v1682_v53, %v1682_v53 }
 0x477   : > { %v1697_v63 = vmul.f32 %v1681_v15, %v1681_v15  ;;  %v2193_v15 = vmul.f32 -1.442695, %v3775_v55 }
 0x478   : > { %1721 = vadd.xlane.f32.xlu1 %v1698_v38 }
 0x479   : > { %1719 = vadd.xlane.f32.xlu0 %v1697_v63  ;;  %2677 = vpow2.f32 %v2193_v15 }
 0x47a   : > { %2679 = vpow2.f32 %v2200_v60 }
 0x47b   : > { %v1630_v49 = vpop.xlane.xlu1 %1629 }
 0x47c   : > { %v1652_v17 = vmul.f32 0.03125, %v1630_v49  ;;  %v1628_v51 = vpop.xlane.xlu0 %1627 }
 0x47d   : > { %v1651_v54 = vmul.f32 0.03125, %v1628_v51  ;;  %v1544_v51 = vadd.f32 1.0, %v2668_v61 }
 0x47e   : > { %v3862_v31 = vsub.f32 %v3789_v34, %v1652_v17  ;;  %v2194_v17 = vmul.f32 -1.442695, %v3773_v11 }
 0x47f   : > { %v3865_v57 = vsub.f32 %v3791_v50, %v1651_v54 }
 0x480   : > { %v1684_v18 = vmul.f32 %v3755_v32, %v3862_v31  ;;  %2681 = vpow2.f32 %v2194_v17 }
 0x481   : > { %v1683_v45 = vmul.f32 %v3755_v32, %v3865_v57  ;;  %2683 = vrcp.f32 %v1544_v51 }
 0x482   : > { %v1700_v48 = vmul.f32 %v1684_v18, %v1684_v18  ;;  %v2670_v18 = vpop.eup %2669 }
 0x483   : > { %v1699_v42 = vmul.f32 %v1683_v45, %v1683_v45  ;;  %v2202_v45 = vmul.f32 -1.442695, %v3805_v41 }
 0x484   : > { %1725 = vadd.xlane.f32.xlu1 %v1700_v48 }
 0x485   : > { %1723 = vadd.xlane.f32.xlu0 %v1699_v42  ;;  %v2195_v42 = vmul.f32 -1.442695, %v3783_v22  ;;  %2685 = vpow2.f32 %v2202_v45  ;;  %v2197_v22 = vmul.f32 -1.442695, %v3791_v50  ;;  %v2201_v50 = vmul.f32 -1.442695, %v3807_v40 }
 0x487   : > { %v1634_v20 = vpop.xlane.xlu1 %1633  ;;  %2687 = vpow2.f32 %v2195_v42 }
 0x488   : > { %v1654_v43 = vmul.f32 0.03125, %v1634_v20  ;;  %v1632_v26 = vpop.xlane.xlu0 %1631  ;;  %v1545_v20 = vadd.f32 1.0, %v2670_v18 }
 0x489   : > { %v1653_v28 = vmul.f32 0.03125, %v1632_v26 }
 0x48a   : > { %v3872_v47 = vsub.f32 %v3797_v39, %v1654_v43  ;;  %v2672_v39 = vpop.eup %2671  ;;  %v2204_v43 = vmul.f32 -1.442695, %v3813_v7  ;;  %2689 = vrcp.f32 %v1545_v20 }
 0x48b   : > { %v3875_v33 = vsub.f32 %v3799_v0, %v1653_v28  ;;  %v2674_v11 = vpop.eup %2673  ;;  %v2196_v28 = vmul.f32 -1.442695, %v3781_v21  ;;  %v2199_v21 = vmul.f32 -1.442695, %v3799_v0 }
 0x48c   : > { %v1686_v12 = vmul.f32 %v3755_v32, %v3872_v47  ;;  %v2676_v26 = vpop.eup %2675  ;;  %2691 = vpow2.f32 %v2204_v43 }
 0x48d   : > { %v1685_v1 = vmul.f32 %v3755_v32, %v3875_v33 }
 0x48e   : > { %v1702_v4 = vmul.f32 %v1686_v12, %v1686_v12  ;;  %v1546_v12 = vadd.f32 1.0, %v2674_v11 }
 0x48f   : > { %v1701_v6 = vmul.f32 %v1685_v1, %v1685_v1  ;;  %v1552_v1 = vadd.f32 1.0, %v2676_v26 }
 0x490   : > { %1729 = vadd.xlane.f32.xlu1 %v1702_v4 }
 0x491   : > { %1727 = vadd.xlane.f32.xlu0 %v1701_v6 }
 0x492   : > { %v1638_v29 = vpop.xlane.xlu1 %1637 }
 0x493   : > { %v1656_v36 = vmul.f32 0.03125, %v1638_v29  ;;  %v1636_v9 = vpop.xlane.xlu0 %1635 }
 0x494   : > { %v1655_v10 = vmul.f32 0.03125, %v1636_v9 }
 0x495   : > { %v3883_v59 = vsub.f32 %v3805_v41, %v1656_v36  ;;  %v2678_v41 = vpop.eup %2677 }
 0x496   : > { %v3886_v14 = vsub.f32 %v3807_v40, %v1655_v10  ;;  %v2680_v4 = vpop.eup %2679  ;;  %v1547_v6 = vadd.f32 1.0, %v2678_v41 }
 0x497   : > { %v1688_v16 = vmul.f32 %v3755_v32, %v3883_v59  ;;  %v2682_v29 = vpop.eup %2681 }
 0x498   : > { %v1687_v24 = vmul.f32 %v3755_v32, %v3886_v14  ;;  %v2684_v2 = vpop.eup %2683  ;;  %v1548_v9 = vadd.f32 1.0, %v2682_v29 }
 0x499   : > { %v1704_v27 = vmul.f32 %v1688_v16, %v1688_v16  ;;  %v2686_v36 = vpop.eup %2685  ;;  %v1924_v19 = vadd.f32 1.0, %v2684_v2 }
 0x49a   : > { %v1703_v30 = vmul.f32 %v1687_v24, %v1687_v24  ;;  %v2688_v10 = vpop.eup %2687  ;;  %v1556_v24 = vadd.f32 1.0, %v2686_v36 }
 0x49b   : > { %1733 = vadd.xlane.f32.xlu1 %v1704_v27  ;;  %v2690_v16 = vpop.eup %2689 }
 0x49c   : > { %1731 = vadd.xlane.f32.xlu0 %v1703_v30  ;;  %v2692_v52 = vpop.eup %2691  ;;  %v1549_v30 = vadd.f32 1.0, %v2688_v10  ;;  %v1925_v37 = vadd.f32 1.0, %v2690_v16 }
 0x49d   : > { %v1642_v44 = vpop.xlane.xlu1 %1641  ;;  %v1558_v0 = vadd.f32 1.0, %v2692_v52 }
 0x49e   : > { %v1658_v8 = vmul.f32 0.03125, %v1642_v44  ;;  %v1640_v53 = vpop.xlane.xlu0 %1639 }
 0x49f   : > { %v1657_v38 = vmul.f32 0.03125, %v1640_v53 }
 0x4a0   : > { %v3898_v63 = vsub.f32 %v3813_v7, %v1658_v8  ;;  %v1554_v7 = vadd.f32 1.0, %v2680_v4  ;;  %v2203_v8 = vmul.f32 -1.442695, %v3815_v56 }
 0x4a1   : > { %v3902_v49 = vsub.f32 %v3815_v56, %v1657_v38 }
 0x4a2   : > { %v1690_v34 = vmul.f32 %v3755_v32, %v3898_v63 }
 0x4a3   : > { %v1689_v55 = vmul.f32 %v3755_v32, %v3902_v49  ;;  %v1543_v32 = vadd.f32 1.0, %v2672_v39 }
 0x4a4   : > { %v1706_v54 = vmul.f32 %v1690_v34, %v1690_v34 }
 0x4a5   : > { %v1705_v48 = vmul.f32 %v1689_v55, %v1689_v55  ;;  %2693 = vrcp.f32 %v1543_v32 }
 0x4a6   : > { %1737 = vadd.xlane.f32.xlu1 %v1706_v54  ;;  %2695 = vpow2.f32 %v2196_v28 }
 0x4a7   : > { %1735 = vadd.xlane.f32.xlu0 %v1705_v48  ;;  %2697 = vrcp.f32 %v1546_v12 }
 0x4a8   : > { %2699 = vrcp.f32 %v1552_v1 }
 0x4a9   : > { %2701 = vpow2.f32 %v2197_v22 }
 0x4aa   : > { %2703 = vrcp.f32 %v1547_v6 }
 0x4ab   : > { %2705 = vrcp.f32 %v1554_v7 }
 0x4ac   : > { %2707 = vpow2.f32 %v2199_v21 }
 0x4ad   : > { %2709 = vrcp.f32 %v1548_v9 }
 0x4ae   : > { %2711 = vrcp.f32 %v1556_v24 }
 0x4af   : > { %v2694_v27 = vpop.eup %2693  ;;  %2713 = vpow2.f32 %v2201_v50 }
 0x4b0   : > { %v2696_v3 = vpop.eup %2695  ;;  %v1923_v53 = vadd.f32 1.0, %v2694_v27  ;;  %2715 = vrcp.f32 %v1549_v30 }
 0x4b1   : > { %v2698_v44 = vpop.eup %2697  ;;  %v1550_v38 = vadd.f32 1.0, %v2696_v3  ;;  %2717 = vrcp.f32 %v1558_v0 }
 0x4b2   : > { %v2700_v15 = vpop.eup %2699  ;;  %v1926_v40 = vadd.f32 1.0, %v2698_v44  ;;  %2719 = vpow2.f32 %v2203_v8 }
 0x4b3   : > { %v2702_v61 = vpop.eup %2701  ;;  %v1932_v34 = vadd.f32 1.0, %v2700_v15  ;;  %2721 = vrcp.f32 %v1550_v38 }
 0x4b4   : > { %v2704_v60 = vpop.eup %2703  ;;  %v1551_v55 = vadd.f32 1.0, %v2702_v61 }
 0x4b5   : > { %v2706_v17 = vpop.eup %2705  ;;  %v1927_v54 = vadd.f32 1.0, %v2704_v60 }
 0x4b6   : > { %v2708_v51 = vpop.eup %2707  ;;  %v1934_v18 = vadd.f32 1.0, %v2706_v17  ;;  %2723 = vrcp.f32 %v1551_v55 }
 0x4b7   : > { %1946 = vperm.xlu1 %2538, %v1924_v19   ;;  %v2710_v56 = vpop.eup %2709  ;;  %v1553_v48 = vadd.f32 1.0, %v2708_v51 }
 0x4b8   : > { %v2712_v45 = vpop.eup %2711  ;;  %v1928_v42 = vadd.f32 1.0, %v2710_v56 }
 0x4b9   : > { %v2714_v39 = vpop.eup %2713  ;;  %v1936_v11 = vadd.f32 1.0, %v2712_v45  ;;  %2725 = vrcp.f32 %v1553_v48 }
 0x4ba   : > { %v2716_v20 = vpop.eup %2715  ;;  %v1555_v32 = vadd.f32 1.0, %v2714_v39 }
 0x4bb   : > { %1951 = vperm.xlu1 %2538, %v1925_v37   ;;  %v2718_v43 = vpop.eup %2717  ;;  %v1929_v28 = vadd.f32 1.0, %v2716_v20 }
 0x4bc   : > { %v2720_v26 = vpop.eup %2719  ;;  %v1938_v41 = vadd.f32 1.0, %v2718_v43  ;;  %2727 = vrcp.f32 %v1555_v32 }
 0x4bd   : > { %1941 = vperm.xlu0 %2537, %v1923_v53   ;;  %v2722_v12 = vpop.eup %2721  ;;  %v1557_v1 = vadd.f32 1.0, %v2720_v26 }
 0x4be   : > { %v1930_v4 = vadd.f32 1.0, %v2722_v12 }
 0x4bf   : > { %1956 = vperm.xlu1 %2538, %v1926_v40   ;;  %2729 = vrcp.f32 %v1557_v1 }
 0x4c0   : > { %v2724_v22 = vpop.eup %2723 }
 0x4c1   : > { %1986 = vperm.xlu0 %2537, %v1932_v34   ;;  %v1931_v6 = vadd.f32 1.0, %v2724_v22 }
 0x4c3   : > { %1961 = vperm.xlu1 %2538, %v1927_v54   ;;  %v2726_v29 = vpop.eup %2725  ;;  %v3917_v54 = vld [vmem:[#allocation8 + $0x1] ss:$0 sm:$0xff] }
 0x4c4   : > { %v1933_v2 = vadd.f32 1.0, %v2726_v29 }
 0x4c5   : > { %1996 = vperm.xlu0 %2537, %v1934_v18  }
 0x4c6   : > { %v2728_v7 = vpop.eup %2727 }
 0x4c7   : > { %1966 = vperm.xlu1 %2538, %v1928_v42   ;;  %v1935_v36 = vadd.f32 1.0, %v2728_v7 }
 0x4c9   : > { %2006 = vperm.xlu0 %2537, %v1936_v11   ;;  %v2730_v21 = vpop.eup %2729 }
 0x4ca   : > { %v1937_v9 = vadd.f32 1.0, %v2730_v21 }
 0x4cb   : > { %1971 = vperm.xlu1 %2538, %v1929_v28   ;;  %v3922_v28 = vld [vmem:[#allocation8 + $0x2] ss:$0 sm:$0xff] }
 0x4cd   : > { %2016 = vperm.xlu0 %2537, %v1938_v41  }
 0x4cf   : > { %1976 = vperm.xlu1 %2538, %v1930_v4  }
 0x4d3   : > { %1981 = vperm.xlu1 %2538, %v1931_v6  }
 0x4d7   : > { %1991 = vperm.xlu1 %2538, %v1933_v2  }
 0x4db   : > { %2001 = vperm.xlu1 %2538, %v1935_v36  }
 0x4df   : > { %2011 = vperm.xlu1 %2538, %v1937_v9  }
 0x4e1   : > { %v1710_v10 = vpop.xlane.xlu1 %1709 }
 0x4e2   : > { %v1708_v19 = vpop.xlane.xlu0 %1707  ;;  %v1740_v16 = vmul.f32 0.03125, %v1710_v10 }
 0x4e3   : > { %v1739_v30 = vmul.f32 0.03125, %v1708_v19 }
 0x4e4   : > { %v1756_v50 = vadd.f32 1e-05, %v1740_v16 }
 0x4e5   : > { %v1755_v44 = vadd.f32 1e-05, %v1739_v30 }
 0x4e6   : > { %2731 = vrsqrt.f32 %v1756_v50 }
 0x4ed   : > { %v1714_v52 = vpop.xlane.xlu1 %1713 }
 0x4ee   : > { %v1712_v24 = vpop.xlane.xlu0 %1711  ;;  %v1742_v3 = vmul.f32 0.03125, %v1714_v52 }
 0x4ef   : > { %v1741_v27 = vmul.f32 0.03125, %v1712_v24 }
 0x4f0   : > { %v1758_v53 = vadd.f32 1e-05, %v1742_v3  ;;  %v2732_v17 = vpop.eup %2731 }
 0x4f1   : > { %v1757_v37 = vadd.f32 1e-05, %v1741_v27  ;;  %v1792_v45 = vmul.f32 %v2732_v17, %v3917_v54 }
 0x4f3   : > { %2733 = vrsqrt.f32 %v1757_v37  ;;  %v1808_v32 = vmul.f32 %v1792_v45, %v3822_v62 }
 0x4f4   : > { %2735 = vrsqrt.f32 %v1755_v44 }
 0x4f5   : > { %2737 = vrsqrt.f32 %v1758_v53  ;;  %v3927_v6 = vadd.f32 %v3922_v28, %v1808_v32 }
 0x4f7   : > { %v1860_v52 = vmul.f32 0.70710677, %v3927_v6 }
 0x4f9   : > { %v1718_v0 = vpop.xlane.xlu1 %1717 }
 0x4fa   : > { %v1716_v8 = vpop.xlane.xlu0 %1715  ;;  %v1744_v61 = vmul.f32 0.03125, %v1718_v0 }
 0x4fb   : > { %v1743_v15 = vmul.f32 0.03125, %v1716_v8 }
 0x4fc   : > { %v1760_v56 = vadd.f32 1e-05, %v1744_v61 }
 0x4fd   : > { %v1759_v60 = vadd.f32 1e-05, %v1743_v15  ;;  %v2734_v48 = vpop.eup %2733 }
 0x4fe   : > { %v2736_v42 = vpop.eup %2735  ;;  %v1793_v26 = vmul.f32 %v2734_v48, %v3917_v54 }
 0x4ff   : > { %2739 = vrsqrt.f32 %v1759_v60  ;;  %v2738_v11 = vpop.eup %2737  ;;  %v1791_v12 = vmul.f32 %v2736_v42, %v3917_v54 }
 0x500   : > { %v1794_v1 = vmul.f32 %v2738_v11, %v3917_v54  ;;  %v1809_v29 = vmul.f32 %v1793_v26, %v3835_v58 }
 0x501   : > { %v1807_v36 = vmul.f32 %v1791_v12, %v3825_v46 }
 0x502   : > { %v1810_v21 = vmul.f32 %v1794_v1, %v3832_v23  ;;  %v3934_v50 = vadd.f32 %v3922_v28, %v1809_v29 }
 0x503   : > { %v3939_v46 = vadd.f32 %v3922_v28, %v1807_v36 }
 0x504   : > { %v3942_v23 = vadd.f32 %v3922_v28, %v1810_v21  ;;  %v1861_v0 = vmul.f32 0.70710677, %v3934_v50 }
 0x505   : > { %v1722_v38 = vpop.xlane.xlu1 %1721  ;;  %v1859_v15 = vmul.f32 0.70710677, %v3939_v46 }
 0x506   : > { %v1720_v40 = vpop.xlane.xlu0 %1719  ;;  %v1746_v20 = vmul.f32 0.03125, %v1722_v38  ;;  %v1862_v38 = vmul.f32 0.70710677, %v3942_v23 }
 0x507   : > { %v1745_v55 = vmul.f32 0.03125, %v1720_v40 }
 0x508   : > { %v1762_v41 = vadd.f32 1e-05, %v1746_v20 }
 0x509   : > { %v1761_v39 = vadd.f32 1e-05, %v1745_v55  ;;  %v2740_v2 = vpop.eup %2739 }
 0x50a   : > { %v1795_v27 = vmul.f32 %v2740_v2, %v3917_v54 }
 0x50c   : > { %v1811_v53 = vmul.f32 %v1795_v27, %v3845_v35 }
 0x511   : > { %v1726_v34 = vpop.xlane.xlu1 %1725 }
 0x512   : > { %v1748_v51 = vmul.f32 0.03125, %v1726_v34  ;;  %v1724_v43 = vpop.xlane.xlu0 %1723 }
 0x513   : > { %v1747_v4 = vmul.f32 0.03125, %v1724_v43 }
 0x514   : > { %v1764_v18 = vadd.f32 1e-05, %v1748_v51  ;;  %v3957_v51 = vadd.f32 %v3922_v28, %v1811_v53 }
 0x515   : > { %v1763_v10 = vadd.f32 1e-05, %v1747_v4 }
 0x516   : > { %2741 = vrsqrt.f32 %v1764_v18  ;;  %v1863_v42 = vmul.f32 0.70710677, %v3957_v51 }
 0x517   : > { %2743 = vrsqrt.f32 %v1760_v56 }
 0x518   : > { %2745 = vrsqrt.f32 %v1761_v39 }
 0x519   : > { %2747 = vrsqrt.f32 %v1762_v41 }
 0x51d   : > { %v1730_v22 = vpop.xlane.xlu1 %1729 }
 0x51e   : > { %v1750_v7 = vmul.f32 0.03125, %v1730_v22  ;;  %v1728_v62 = vpop.xlane.xlu0 %1727 }
 0x51f   : > { %v1749_v16 = vmul.f32 0.03125, %v1728_v62 }
 0x520   : > { %v2742_v9 = vpop.eup %2741  ;;  %v1766_v19 = vadd.f32 1e-05, %v1750_v7 }
 0x521   : > { %v2744_v24 = vpop.eup %2743  ;;  %v1800_v58 = vmul.f32 %v2742_v9, %v3917_v54  ;;  %v1765_v37 = vadd.f32 1e-05, %v1749_v16  ;;  %v1844_v9 = vmul.f32 0.5, %v3927_v6 }
 0x522   : > { %2749 = vrsqrt.f32 %v1766_v19  ;;  %v2746_v3 = vpop.eup %2745  ;;  %v1796_v44 = vmul.f32 %v2744_v24, %v3917_v54 }
 0x523   : > { %v1816_v30 = vmul.f32 %v1800_v58, %v3862_v31  ;;  %2751 = vrsqrt.f32 %v1763_v10  ;;  %v1797_v61 = vmul.f32 %v2746_v3, %v3917_v54  ;;  %v2748_v34 = vpop.eup %2747  ;;  %v1843_v3 = vmul.f32 0.5, %v3939_v46 }
 0x524   : > { %2753 = verf.f32 %v1860_v52  ;;  %v1812_v60 = vmul.f32 %v1796_v44, %v3842_v5  ;;  %v1798_v5 = vmul.f32 %v2748_v34, %v3917_v54 }
 0x525   : > { %v3948_v8 = vadd.f32 %v3922_v28, %v1816_v30  ;;  %2755 = vrsqrt.f32 %v1765_v37  ;;  %v1813_v18 = vmul.f32 %v1797_v61, %v3855_v25 }
 0x526   : > { %2757 = verf.f32 %v1861_v0  ;;  %v3961_v39 = vadd.f32 %v3922_v28, %v1812_v60  ;;  %v1814_v12 = vmul.f32 %v1798_v5, %v3852_v13  ;;  %v1845_v0 = vmul.f32 0.5, %v3934_v50 }
 0x527   : > { %v1868_v40 = vmul.f32 0.70710677, %v3948_v8  ;;  %2759 = verf.f32 %v1859_v15  ;;  %v3968_v25 = vadd.f32 %v3922_v28, %v1813_v18 }
 0x528   : > { %v1734_v31 = vpop.xlane.xlu1 %1733  ;;  %2761 = verf.f32 %v1862_v38  ;;  %v1864_v26 = vmul.f32 0.70710677, %v3961_v39  ;;  %v3980_v13 = vadd.f32 %v3922_v28, %v1814_v12 }
 0x529   : > { %v1752_v17 = vmul.f32 0.03125, %v1734_v31  ;;  %v1732_v55 = vpop.xlane.xlu0 %1731  ;;  %2763 = verf.f32 %v1868_v40 }
 0x52a   : > { %v1751_v35 = vmul.f32 0.03125, %v1732_v55  ;;  %v1866_v61 = vmul.f32 0.70710677, %v3980_v13 }
 0x52b   : > { %v1768_v56 = vadd.f32 1e-05, %v1752_v17 }
 0x52c   : > { %v2750_v45 = vpop.eup %2749  ;;  %v1767_v48 = vadd.f32 1e-05, %v1751_v35 }
 0x52d   : > { %2765 = vrsqrt.f32 %v1768_v56  ;;  %v1802_v20 = vmul.f32 %v2750_v45, %v3917_v54  ;;  %v2752_v11 = vpop.eup %2751  ;;  %v1846_v56 = vmul.f32 0.5, %v3942_v23 }
 0x52e   : > { %2767 = vrsqrt.f32 %v1767_v48  ;;  %v2754_v43 = vpop.eup %2753  ;;  %v1799_v1 = vmul.f32 %v2752_v11, %v3917_v54  ;;  %v1852_v48 = vmul.f32 0.5, %v3948_v8 }
 0x52f   : > { %v1818_v32 = vmul.f32 %v1802_v20, %v3872_v47  ;;  %2769 = verf.f32 %v1863_v42  ;;  %v2756_v4 = vpop.eup %2755  ;;  %v1892_v22 = vadd.f32 1.0, %v2754_v43  ;;  %v1865_v47 = vmul.f32 0.70710677, %v3968_v25 }
 0x530   : > { %v2758_v29 = vpop.eup %2757  ;;  %2771 = verf.f32 %v1864_v26  ;;  %v1815_v16 = vmul.f32 %v1799_v1, %v3865_v57  ;;  %v1801_v24 = vmul.f32 %v2756_v4, %v3917_v54  ;;  %v1847_v4 = vmul.f32 0.5, %v3957_v51 }
 0x531   : > { %v3973_v41 = vadd.f32 %v3922_v28, %v1818_v32  ;;  %v2760_v62 = vpop.eup %2759  ;;  %v1908_v27 = vmul.f32 %v1892_v22, %v1844_v9  ;;  %v1893_v30 = vadd.f32 1.0, %v2758_v29 }
 0x532   : > { %v2762_v10 = vpop.eup %2761  ;;  %v1891_v53 = vadd.f32 1.0, %v2760_v62  ;;  %v3989_v31 = vadd.f32 %v3922_v28, %v1815_v16  ;;  %v1817_v46 = vmul.f32 %v1801_v24, %v3875_v33 }
 0x533   : > { %v1738_v2 = vpop.xlane.xlu1 %1737  ;;  %v1870_v7 = vmul.f32 0.70710677, %v3973_v41  ;;  %v2764_v52 = vpop.eup %2763  ;;  %v1909_v50 = vmul.f32 %v1893_v30, %v1845_v0  ;;  %v1894_v60 = vadd.f32 1.0, %v2762_v10 }
 0x534   : > { %v1754_v36 = vmul.f32 0.03125, %v1738_v2  ;;  %v1736_v21 = vpop.xlane.xlu0 %1735  ;;  %v1907_v35 = vmul.f32 %v1891_v53, %v1843_v3  ;;  %v1900_v18 = vadd.f32 1.0, %v2764_v52  ;;  %v1867_v20 = vmul.f32 0.70710677, %v3989_v31 }
 0x535   : > { %v1753_v19 = vmul.f32 0.03125, %v1736_v21  ;;  %2773 = verf.f32 %v1870_v7  ;;  %v1910_v23 = vmul.f32 %v1894_v60, %v1846_v56  ;;  %v1854_v2 = vmul.f32 0.5, %v3973_v41 }
 0x536   : > { %v1770_v58 = vadd.f32 1e-05, %v1754_v36  ;;  %2775 = verf.f32 %v1865_v47  ;;  %v1916_v1 = vmul.f32 %v1900_v18, %v1852_v48 }
 0x537   : > { %v2766_v37 = vpop.eup %2765  ;;  %v1769_v6 = vadd.f32 1e-05, %v1753_v19  ;;  %v1947_v44 = vpop.permute.xlu1 %1946 }
 0x538   : > { %v2768_v15 = vpop.eup %2767  ;;  %2777 = vrsqrt.f32 %v1770_v58  ;;  %v2020_v38 = vmul.f32 %v1947_v44, %v1908_v27  ;;  %v1804_v57 = vmul.f32 %v2766_v37, %v3917_v54  ;;  %v1848_v58 = vmul.f32 0.5, %v3961_v39 }
 0x539   : > { %2779 = vrsqrt.f32 %v1769_v6  ;;  %v1803_v40 = vmul.f32 %v2768_v15, %v3917_v54  ;;  %v2770_v17 = vpop.eup %2769 }
 0x53a   : > { %2036 = vst [vmem:[%s3995_s13 + $0x8] sm:$0xff] %v2020_v38  ;;  %v1820_v34 = vmul.f32 %v1804_v57, %v3883_v59  ;;  %2781 = verf.f32 %v1866_v61  ;;  %v4004_v59 = vadd.f32 %v3922_v28, %v1817_v46  ;;  %v2772_v43 = vpop.eup %2771  ;;  %v1895_v32 = vadd.f32 1.0, %v2770_v17 }
 0x53b   : > { %v1952_v55 = vpop.permute.xlu1 %1951  ;;  %v1819_v11 = vmul.f32 %v1803_v40, %v3886_v14  ;;  %v1896_v10 = vadd.f32 1.0, %v2772_v43 }
 0x53c   : > { %v2021_v33 = vmul.f32 %v1952_v55, %v1909_v50  ;;  %v1942_v45 = vpop.permute.xlu0 %1941  ;;  %v1840_v5 = vadd.f32 %v3922_v28, %v1820_v34  ;;  %v1869_v62 = vmul.f32 0.70710677, %v4004_v59  ;;  %v1911_v9 = vmul.f32 %v1895_v32, %v1847_v4 }
 0x53d   : > { %v2019_v42 = vmul.f32 %v1942_v45, %v1907_v35  ;;  %v4013_v36 = vadd.f32 %v3922_v28, %v1819_v11  ;;  %v1912_v44 = vmul.f32 %v1896_v10, %v1848_v58  ;;  %v1853_v32 = vmul.f32 0.5, %v4004_v59 }
 0x53e   : > { %2037 = vst [vmem:[%s3995_s13 + $0x10] sm:$0xff] %v2021_v33  ;;  %v1872_v26 = vmul.f32 0.70710677, %v1840_v5  ;;  %v1856_v34 = vmul.f32 0.5, %v1840_v5  ;;  %v1851_v5 = vmul.f32 0.5, %v3989_v31 }
 0x53f   : > { %v2774_v12 = vpop.eup %2773  ;;  %2035 = vst [vmem:[%s3995_s13] sm:$0xff] %v2019_v42  ;;  %v1957_v8 = vpop.permute.xlu1 %1956  ;;  %v1871_v37 = vmul.f32 0.70710677, %v4013_v36 }
 0x540   : > { %v2022_v22 = vmul.f32 %v1957_v8, %v1910_v23  ;;  %v1987_v29 = vpop.permute.xlu0 %1986  ;;  %v1902_v7 = vadd.f32 1.0, %v2774_v12  ;;  %2783 = verf.f32 %v1872_v26  ;;  %v2776_v14 = vpop.eup %2775 }
 0x541   : > { %v2028_v47 = vmul.f32 %v1987_v29, %v1916_v1  ;;  %2785 = verf.f32 %v1867_v20  ;;  %v1897_v0 = vadd.f32 1.0, %v2776_v14 }
 0x542   : > { %v2778_v21 = vpop.eup %2777  ;;  %2038 = vst [vmem:[%s3995_s13 + $0x18] sm:$0xff] %v2022_v22  ;;  %v1918_v51 = vmul.f32 %v1902_v7, %v1854_v2  ;;  %2787 = verf.f32 %v1869_v62  ;;  %v1855_v7 = vmul.f32 0.5, %v4013_v36 }
 0x543   : > { %v2780_v19 = vpop.eup %2779  ;;  %2044 = vst [vmem:[%s3995_s13 + $0x48] sm:$0xff] %v2028_v47  ;;  %v1962_v41 = vpop.permute.xlu1 %1961  ;;  %v1806_v16 = vmul.f32 %v2778_v21, %v3917_v54  ;;  %2789 = verf.f32 %v1871_v37 }
 0x544   : > { %v2023_v24 = vmul.f32 %v1962_v41, %v1911_v9  ;;  %v1997_v52 = vpop.permute.xlu0 %1996  ;;  %v1805_v27 = vmul.f32 %v2780_v19, %v3917_v54  ;;  %v2782_v6 = vpop.eup %2781  ;;  %v1849_v54 = vmul.f32 0.5, %v3968_v25  ;;  %v1850_v25 = vmul.f32 0.5, %v3980_v13 }
 0x545   : > { %v2030_v30 = vmul.f32 %v1997_v52, %v1918_v51  ;;  %v1822_v3 = vmul.f32 %v1806_v16, %v3898_v63  ;;  %v1898_v40 = vadd.f32 1.0, %v2782_v6 }
 0x546   : > { %2039 = vst [vmem:[%s3995_s13 + $0x20] sm:$0xff] %v2023_v24  ;;  %v1821_v53 = vmul.f32 %v1805_v27, %v3902_v49  ;;  %v1913_v46 = vmul.f32 %v1897_v0, %v1849_v54 }
 0x547   : > { %2046 = vst [vmem:[%s3995_s13 + $0x58] sm:$0xff] %v2030_v30  ;;  %v1967_v15 = vpop.permute.xlu1 %1966  ;;  %v1842_v38 = vadd.f32 %v3922_v28, %v1822_v3  ;;  %v1914_v56 = vmul.f32 %v1898_v40, %v1850_v25 }
 0x548   : > { %v2024_v39 = vmul.f32 %v1967_v15, %v1912_v44  ;;  %v1841_v57 = vadd.f32 %v3922_v28, %v1821_v53  ;;  %v2007_v28 = vpop.permute.xlu0 %2006 }
 0x549   : > { %v1874_v63 = vmul.f32 0.70710677, %v1842_v38  ;;  %v1858_v12 = vmul.f32 0.5, %v1842_v38 }
 0x54a   : > { %v2784_v61 = vpop.eup %2783  ;;  %2040 = vst [vmem:[%s3995_s13 + $0x28] sm:$0xff] %v2024_v39  ;;  %v1873_v50 = vmul.f32 0.70710677, %v1841_v57  ;;  %v1857_v51 = vmul.f32 0.5, %v1841_v57 }
 0x54b   : > { %v2786_v60 = vpop.eup %2785  ;;  %v1904_v49 = vadd.f32 1.0, %v2784_v61  ;;  %v1972_v17 = vpop.permute.xlu1 %1971  ;;  %2791 = verf.f32 %v1874_v63 }
 0x54c   : > { %v2025_v55 = vmul.f32 %v1972_v17, %v1913_v46  ;;  %2793 = verf.f32 %v1873_v50  ;;  %v1899_v18 = vadd.f32 1.0, %v2786_v60  ;;  %v2788_v33 = vpop.eup %2787  ;;  %v2017_v14 = vpop.permute.xlu0 %2016 }
 0x54d   : > { %v1920_v35 = vmul.f32 %v1904_v49, %v1856_v34  ;;  %v1901_v11 = vadd.f32 1.0, %v2788_v33  ;;  %v2790_v43 = vpop.eup %2789 }
 0x54e   : > { %2041 = vst [vmem:[%s3995_s13 + $0x30] sm:$0xff] %v2025_v55  ;;  %v1915_v20 = vmul.f32 %v1899_v18, %v1851_v5  ;;  %v1903_v4 = vadd.f32 1.0, %v2790_v43 }
 0x54f   : > { %v2032_v45 = vmul.f32 %v2007_v28, %v1920_v35  ;;  %v1977_v48 = vpop.permute.xlu1 %1976  ;;  %v1917_v1 = vmul.f32 %v1901_v11, %v1853_v32 }
 0x550   : > { %v2026_v42 = vmul.f32 %v1977_v48, %v1914_v56  ;;  %v1919_v59 = vmul.f32 %v1903_v4, %v1855_v7 }
 0x551   : > { %2048 = vst [vmem:[%s3995_s13 + $0x68] sm:$0xff] %v2032_v45 }
 0x552   : > { %2042 = vst [vmem:[%s3995_s13 + $0x38] sm:$0xff] %v2026_v42 }
 0x553   : > { %v1982_v23 = vpop.permute.xlu1 %1981 }
 0x554   : > { %v2027_v13 = vmul.f32 %v1982_v23, %v1915_v20 }
 0x555   : > { %v2792_v26 = vpop.eup %2791 }
 0x556   : > { %v1906_v8 = vadd.f32 1.0, %v2792_v26  ;;  %2043 = vst [vmem:[%s3995_s13 + $0x40] sm:$0xff] %v2027_v13  ;;  %v2794_v31 = vpop.eup %2793 }
 0x557   : > { %v1992_v22 = vpop.permute.xlu1 %1991  ;;  %v1905_v62 = vadd.f32 1.0, %v2794_v31 }
 0x558   : > { %v1922_v29 = vmul.f32 %v1906_v8, %v1858_v12  ;;  %v2029_v2 = vmul.f32 %v1992_v22, %v1917_v1 }
 0x559   : > { %v1921_v10 = vmul.f32 %v1905_v62, %v1857_v51 }
 0x55a   : > { %v2034_v47 = vmul.f32 %v2017_v14, %v1922_v29  ;;  %2045 = vst [vmem:[%s3995_s13 + $0x50] sm:$0xff] %v2029_v2 }
 0x55b   : > { %v2002_v21 = vpop.permute.xlu1 %2001 }
 0x55c   : > { %2050 = vst [vmem:[%s3995_s13 + $0x78] sm:$0xff] %v2034_v47  ;;  %v2031_v9 = vmul.f32 %v2002_v21, %v1919_v59 }
 0x55e   : > { %2047 = vst [vmem:[%s3995_s13 + $0x60] sm:$0xff] %v2031_v9 }
 0x55f   : > { %v2012_v19 = vpop.permute.xlu1 %2011 }
 0x560   : > { %v2033_v36 = vmul.f32 %v2012_v19, %v1921_v10 }
 0x562   : > { %2049 = vst [vmem:[%s3995_s13 + $0x70] sm:$0xff] %v2033_v36 }
 0x563   : > { %2925 = shalt.err (!%p2922_p4)
}
 0x564   : > { %s2926_s6 = scalar_lea.hbm %s4045_s9, 2048  ;;  %s2930_s23 = scalar_lea.hbm %s4097_s5, 4096 }
 0x565   : > { %p2927_p9 = scmp.ne.s32.totalorder %s4045_s9, %s2926_s6  ;;  %p2931_p8 = scmp.lt.u32.totalorder %s4045_s9, %s4097_s5 }
 0x566   : > { %p2932_p13 = scmp.lt.u32.totalorder %s2930_s23, %s2926_s6  ;;  %p2934_p10 = scmp.lt.u32.totalorder %s2926_s6, %s4045_s9 }
 0x567   : > { %p2928_p0 = pnand %p2927_p9, %p3179_p5 }
 0x568   : > { %p2933_p6 = por %p2932_p13, %p2931_p8 }
 0x569   : > { %p2929_p11 = pneg %p2928_p0 }
 0x56a   : > { %p2935_p3 = por %p2934_p10, %p2933_p6 }
 0x56c   : > { %p2936_p7 = pnand %p2935_p3, %p2929_p11 }
 0x56e   : > { %2939 = shalt.err (!%p2936_p7)
}
 0x56f   : > { %s2996_s8 = smov 128   ;;  %s2997_s28 = smov 8  }
 0x570   : > { %2469 = dma.vmem_to_hbm [thread:$0]  (%p3179_p5), %s4047_s16, 2048, %s4045_s9, %s2052_s15, %s2996_s8, %s2996_s8, %s2997_s28  }
 0x571 PF: > { %s2080_s12 = sand.u32 1, %s2974_s18   ;;  %p4115_p12 = scmp.ne.s32.totalorder %s4102_s25, 0 }
 0x572   : > { %p4116_p1 = scmp.ge.s32.totalorder %s2986_s21, 2  ;;  %s2081_s29 = scalar_lea.sflag [#allocation4], %s2080_s12 }
 0x574   : > { %p2486_p2 = pnand %p4116_p1, %p4115_p12 }
 0x576   : > { %2969 = dma.done.wait (!%p2486_p2), %s2081_s29, 2048  }
 0x577   : > { %2971 = vsyncadd (!%p2486_p2), %s2081_s29, 4294965248  ;;  %p20_p4 = scmp.ge.s32.totalorder %s3165_s14, 4   ;;  %s4117_s18 = smov %s2978_s19 }
 0x578   : > { %s4118_s19 = smov %s2982_s20  ;;  %s4119_s20 = smov %s3175_s30 }
 0x579   : > { %s4120_s21 = smov %s3165_s14  ;;  %22 = sbr.rel (!%p20_p4) target bundleno = 7 (0x7), region = 97 }
 0x580   :  { %2086 = vsyncpa [#allocation3], 1 }
 0x581   :  { %2088 = vsyncpa [#allocation3 + $0x1], 1 }
 0x582   :  { %2089 = vsyncpa [#allocation6], 1 }
 0x583   :  { %2090 = vsyncpa [#allocation9], 1 }
 0x584   :  { %2091 = vsyncpa [#allocation4], 1 }
 0x585   :  { %2093 = vsyncpa [#allocation4 + $0x1], 1 }

</bundles_post_ra>
